<compile_context>
chip_gen: v6e
topology: v6e:2x2x1
jax: 0.10.0
libtpu: 0.0.40
codegen_flags: <defaults>
</compile_context>

<pallas_src>
import jax
import jax.numpy as jnp
from jax.experimental import pallas as pl
from jax.experimental.pallas import tpu as pltpu


def _surface_mask(ext):
    """ext: (tile_d + 2, H, W) f32 slab with one (possibly zeroed) halo plane on
    each side of the D axis.  Returns bool (tile_d, H, W): True where the
    central-difference gradient magnitude of the zero-padded volume is > 0,
    i.e. where any of the three central differences is nonzero (sqrt-free)."""
    c = ext[1:-1]                                   # the tile itself

    # D axis (uses the halo planes).
    dx_nz = ext[2:] != ext[:-2]

    # H axis (sublanes), zero fill at the volume edge.
    zrow = jnp.zeros_like(c[:, :1, :])
    h_plus = jnp.concatenate([c[:, 1:, :], zrow], axis=1)
    h_minus = jnp.concatenate([zrow, c[:, :-1, :]], axis=1)
    dy_nz = h_plus != h_minus

    # W axis (lanes), zero fill at the volume edge.
    zcol = jnp.zeros_like(c[:, :, :1])
    w_plus = jnp.concatenate([c[:, :, 1:], zcol], axis=2)
    w_minus = jnp.concatenate([zcol, c[:, :, :-1]], axis=2)
    dz_nz = w_plus != w_minus

    return dx_nz | dy_nz | dz_nz


def boundary_loss_kernel(p_c_ref, p_lo_ref, p_hi_ref,
                         t_c_ref, t_lo_ref, t_hi_ref,
                         loss_ref, acc_ref):
    i = pl.program_id(0)
    is_first = i == 0
    is_last = i == pl.num_programs(0) - 1

    @pl.when(is_first)
    def _init():
        acc_ref[0] = jnp.float32(0.0)   # sum(p_set * t_set)
        acc_ref[1] = jnp.float32(0.0)   # sum(p_set)
        acc_ref[2] = jnp.float32(0.0)   # sum(t_set)

    def slab(c_ref, lo_ref, hi_ref, apply_sigmoid):
        # Cast after the DMA so inputs can stay bf16/int in HBM.
        c = c_ref[...].astype(jnp.float32)
        lo = lo_ref[...].astype(jnp.float32)
        hi = hi_ref[...].astype(jnp.float32)
        if apply_sigmoid:
            c = jax.nn.sigmoid(c)
            lo = jax.nn.sigmoid(lo)
            hi = jax.nn.sigmoid(hi)
        # Outside the volume the (post-sigmoid) padding value is exactly 0.
        lo = jnp.where(is_first, jnp.zeros_like(lo), lo)
        hi = jnp.where(is_last, jnp.zeros_like(hi), hi)
        return jnp.concatenate([lo, c, hi], axis=0)        # (tile_d + 2, H, W)

    p_mask = _surface_mask(slab(p_c_ref, p_lo_ref, p_hi_ref, True))
    t_mask = _surface_mask(slab(t_c_ref, t_lo_ref, t_hi_ref, False))

    acc_ref[0] += jnp.sum((p_mask & t_mask).astype(jnp.float32))
    acc_ref[1] += jnp.sum(p_mask.astype(jnp.float32))
    acc_ref[2] += jnp.sum(t_mask.astype(jnp.float32))

    @pl.when(is_last)
    def _finalize():
        smooth = jnp.float32(1e-7)
        dice = (2.0 * acc_ref[0] + smooth) / (acc_ref[1] + acc_ref[2] + smooth)
        loss_ref[0, 0] = jnp.float32(1.0) - dice


def _pick_tile_d(D, H, W, in_itemsize, budget_bytes=16 * 1024 * 1024):
    """Largest tile_d dividing D whose estimated per-step working set fits budget
    (sized conservatively so it also fits v7x's smaller VMEM)."""
    best = 1
    for t in range(1, D + 1):
        if D % t:
            continue
        # 2 volumes x 2 pipeline buffers x (tile + 2 halo planes) of input dtype,
        # plus ~10 tile-sized f32 temporaries inside the kernel body.
        est = 2 * 2 * (t + 2) * H * W * in_itemsize + 10 * t * H * W * 4
        if est <= budget_bytes:
            best = t
    return best


def boundary_loss(preds, targets, *, tile_d=None, vmem_limit_bytes=48 * 1024 * 1024):
    """preds, targets: (N, C, D, H, W). Returns the scalar boundary loss (f32).

    Only the [0, 0] volume is used, exactly as in the PyTorch module.  Inputs are
    consumed in their native dtype (feed bf16 to halve HBM traffic); the f32 cast
    happens inside the kernel after the DMA.
    """
    p_vol = preds[0, 0]
    t_vol = targets[0, 0]
    D, H, W = p_vol.shape

    if tile_d is None:
        itemsize = max(jnp.dtype(p_vol.dtype).itemsize, jnp.dtype(t_vol.dtype).itemsize)
        tile_d = _pick_tile_d(D, H, W, itemsize)
    if D % tile_d != 0:
        raise ValueError(f"tile_d={tile_d} must divide D={D}")
    num_blocks = D // tile_d

    center_spec = pl.BlockSpec((tile_d, H, W), lambda i: (i, 0, 0))
    # Halo planes: block size 1 along D => returned index is the plane index.
    # Clamped at the volume edges; the kernel zeroes the out-of-volume halo.
    lo_spec = pl.BlockSpec((1, H, W),
                           lambda i: (jnp.maximum(i * tile_d - 1, 0), 0, 0))
    hi_spec = pl.BlockSpec((1, H, W),
                           lambda i: (jnp.minimum(i * tile_d + tile_d, D - 1), 0, 0))

    grid_spec = pltpu.PrefetchScalarGridSpec(
        num_scalar_prefetch=0,
        grid=(num_blocks,),
        in_specs=[center_spec, lo_spec, hi_spec,     # preds volume
                  center_spec, lo_spec, hi_spec],    # targets volume
        out_specs=pl.BlockSpec((1, 1), lambda i: (0, 0),
                               memory_space=pltpu.MemorySpace.SMEM),
        scratch_shapes=[pltpu.SMEM((3,), jnp.float32)],
    )

    loss = pl.pallas_call(
        boundary_loss_kernel,
        out_shape=jax.ShapeDtypeStruct((1, 1), jnp.float32),
        grid_spec=grid_spec,
        compiler_params=pltpu.CompilerParams(
            # The D axis carries the SMEM accumulator => must run sequentially.
            dimension_semantics=("arbitrary",),
            vmem_limit_bytes=vmem_limit_bytes,
        ),
    )(p_vol, p_vol, p_vol, t_vol, t_vol, t_vol)
    return loss[0, 0]


def _reference_loss(preds, targets):
    """Pure-JAX reference mirroring the PyTorch module exactly (pad + sqrt)."""
    p = jax.nn.sigmoid(preds[0, 0].astype(jnp.float32))
    t = targets[0, 0].astype(jnp.float32)

    def surface(vol):
        pad = jnp.pad(vol, ((1, 1), (1, 1), (1, 1)))
        dz = pad[1:-1, 1:-1, 2:] - pad[1:-1, 1:-1, :-2]
        dy = pad[1:-1, 2:, 1:-1] - pad[1:-1, :-2, 1:-1]
        dx = pad[2:, 1:-1, 1:-1] - pad[:-2, 1:-1, 1:-1]
        mag = jnp.sqrt(dx * dx + dy * dy + dz * dz)
        return jnp.where(mag > 0.0, 1.0, 0.0).astype(jnp.float32)

    p_set = surface(p)
    t_set = surface(t)
    smooth = 1e-7
    inter = jnp.sum(p_set * t_set)
    dice = (2.0 * inter + smooth) / (jnp.sum(p_set) + jnp.sum(t_set) + smooth)
    return 1.0 - dice


if __name__ == "__main__":
    key = jax.random.PRNGKey(0)
    k1, k2 = jax.random.split(key)

    # 5-D NCDHW inputs; the module only consumes the [0, 0] volume.
    N, C, D, H, W = 2, 2, 16, 16, 128
    preds = jax.random.normal(k1, (N, C, D, H, W), dtype=jnp.float32)
    targets = jax.random.bernoulli(k2, p=0.3, shape=(N, C, D, H, W)).astype(jnp.float32)

    ref = jax.block_until_ready(_reference_loss(preds, targets))

    # Multi-step grid (4 D-slabs): exercises halo planes + SMEM accumulation.
    loss_tiled = jax.block_until_ready(boundary_loss(preds, targets, tile_d=4))
    assert jnp.allclose(loss_tiled, ref, atol=1e-5, rtol=1e-5), (loss_tiled, ref)

    # Automatic tile selection (single slab at this toy size).
    loss_auto = jax.block_until_ready(boundary_loss(preds, targets))
    assert jnp.allclose(loss_auto, ref, atol=1e-5, rtol=1e-5), (loss_auto, ref)

    # Native bf16 inputs (no wrapper cast; halves HBM traffic on real volumes).
    preds_bf16 = preds.astype(jnp.bfloat16)
    targets_bf16 = targets.astype(jnp.bfloat16)
    ref_bf16 = jax.block_until_ready(_reference_loss(preds_bf16, targets_bf16))
    loss_bf16 = jax.block_until_ready(boundary_loss(preds_bf16, targets_bf16, tile_d=8))
    assert jnp.allclose(loss_bf16, ref_bf16, atol=1e-5, rtol=1e-5), (loss_bf16, ref_bf16)

    print("KERNEL_OK")
</pallas_src>

<mosaic_0001>
module attributes {stable_mosaic.version = 11 : i64} {
  func.func @boundary_loss_kernel(%arg0: i32, %arg1: memref<4x16x128xf32, #tpu.memory_space<vmem>>, %arg2: memref<1x16x128xf32, #tpu.memory_space<vmem>>, %arg3: memref<1x16x128xf32, #tpu.memory_space<vmem>>, %arg4: memref<4x16x128xf32, #tpu.memory_space<vmem>>, %arg5: memref<1x16x128xf32, #tpu.memory_space<vmem>>, %arg6: memref<1x16x128xf32, #tpu.memory_space<vmem>>, %arg7: memref<1x1xf32, #tpu.memory_space<smem>>, %arg8: memref<3xf32, #tpu.memory_space<smem>>) attributes {dimension_semantics = [#tpu.dimension_semantics<arbitrary>], iteration_bounds = array<i64: 4>, scalar_prefetch = 0 : i64, scratch_operands = 1 : i64, tpu.core_type = #tpu.core_type<tc>, window_params = [{transform_indices = @transform_0, window_bounds = array<i64: 4, 16, 128>}, {transform_indices = @transform_1, window_bounds = array<i64: 1, 16, 128>}, {transform_indices = @transform_2, window_bounds = array<i64: 1, 16, 128>}, {transform_indices = @transform_3, window_bounds = array<i64: 4, 16, 128>}, {transform_indices = @transform_4, window_bounds = array<i64: 1, 16, 128>}, {transform_indices = @transform_5, window_bounds = array<i64: 1, 16, 128>}, {transform_indices = @transform_6, window_bounds = array<i64: 1, 1>}]} {
    %c0_i32 = arith.constant 0 : i32
    %0 = arith.cmpi eq, %arg0, %c0_i32 : i32
    %c3_i32 = arith.constant 3 : i32
    %1 = arith.cmpi eq, %arg0, %c3_i32 : i32
    %2 = arith.extui %0 : i1 to i32
    %c0_i32_0 = arith.constant 0 : i32
    %3 = arith.cmpi ne, %2, %c0_i32_0 : i32
    scf.if %3 {
      %cst_36 = arith.constant 0.000000e+00 : f32
      %c0_37 = arith.constant 0 : index
      %101 = memref.load %arg8[%c0_37] : memref<3xf32, #tpu.memory_space<smem>>
      memref.store %cst_36, %arg8[%c0_37] : memref<3xf32, #tpu.memory_space<smem>>
      %cst_38 = arith.constant 0.000000e+00 : f32
      %c1_39 = arith.constant 1 : index
      %102 = memref.load %arg8[%c1_39] : memref<3xf32, #tpu.memory_space<smem>>
      memref.store %cst_38, %arg8[%c1_39] : memref<3xf32, #tpu.memory_space<smem>>
      %cst_40 = arith.constant 0.000000e+00 : f32
      %c2_41 = arith.constant 2 : index
      %103 = memref.load %arg8[%c2_41] : memref<3xf32, #tpu.memory_space<smem>>
      memref.store %cst_40, %arg8[%c2_41] : memref<3xf32, #tpu.memory_space<smem>>
    } else {
    }
    %c0 = arith.constant 0 : index
    %c0_1 = arith.constant 0 : index
    %c0_2 = arith.constant 0 : index
    %4 = vector.load %arg1[%c0, %c0_1, %c0_2] : memref<4x16x128xf32, #tpu.memory_space<vmem>>, vector<4x16x128xf32>
    %c0_3 = arith.constant 0 : index
    %c0_4 = arith.constant 0 : index
    %c0_5 = arith.constant 0 : index
    %5 = vector.load %arg2[%c0_3, %c0_4, %c0_5] : memref<1x16x128xf32, #tpu.memory_space<vmem>>, vector<1x16x128xf32>
    %c0_6 = arith.constant 0 : index
    %c0_7 = arith.constant 0 : index
    %c0_8 = arith.constant 0 : index
    %6 = vector.load %arg3[%c0_6, %c0_7, %c0_8] : memref<1x16x128xf32, #tpu.memory_space<vmem>>, vector<1x16x128xf32>
    %7 = arith.negf %4 : vector<4x16x128xf32>
    %8 = math.exp %7 : vector<4x16x128xf32>
    %cst = arith.constant 1.000000e+00 : f32
    %9 = vector.broadcast %cst : f32 to vector<4x16x128xf32>
    %10 = arith.addf %9, %8 : vector<4x16x128xf32>
    %11 = arith.divf %9, %10 : vector<4x16x128xf32>
    %12 = arith.negf %5 : vector<1x16x128xf32>
    %13 = math.exp %12 : vector<1x16x128xf32>
    %cst_9 = arith.constant 1.000000e+00 : f32
    %14 = vector.broadcast %cst_9 : f32 to vector<1x16x128xf32>
    %15 = arith.addf %14, %13 : vector<1x16x128xf32>
    %16 = arith.divf %14, %15 : vector<1x16x128xf32>
    %17 = arith.negf %6 : vector<1x16x128xf32>
    %18 = math.exp %17 : vector<1x16x128xf32>
    %cst_10 = arith.constant 1.000000e+00 : f32
    %19 = vector.broadcast %cst_10 : f32 to vector<1x16x128xf32>
    %20 = arith.addf %19, %18 : vector<1x16x128xf32>
    %21 = arith.divf %19, %20 : vector<1x16x128xf32>
    %cst_11 = arith.constant 0.000000e+00 : f32
    %22 = vector.broadcast %cst_11 : f32 to vector<1x16x128xf32>
    %23 = arith.select %0, %22, %16 : vector<1x16x128xf32>
    %cst_12 = arith.constant 0.000000e+00 : f32
    %24 = vector.broadcast %cst_12 : f32 to vector<1x16x128xf32>
    %25 = arith.select %1, %24, %21 : vector<1x16x128xf32>
    %26 = tpu.concatenate %23, %11, %25 in 0 : vector<1x16x128xf32>, vector<4x16x128xf32>, vector<1x16x128xf32> -> vector<6x16x128xf32>
    %27 = vector.extract_strided_slice %26 {offsets = [1, 0, 0], sizes = [4, 16, 128], strides = [1, 1, 1]} : vector<6x16x128xf32> to vector<4x16x128xf32>
    %28 = vector.extract_strided_slice %26 {offsets = [2, 0, 0], sizes = [4, 16, 128], strides = [1, 1, 1]} : vector<6x16x128xf32> to vector<4x16x128xf32>
    %29 = vector.extract_strided_slice %26 {offsets = [0, 0, 0], sizes = [4, 16, 128], strides = [1, 1, 1]} : vector<6x16x128xf32> to vector<4x16x128xf32>
    %30 = arith.cmpf one, %28, %29 : vector<4x16x128xf32>
    %cst_13 = arith.constant 0.000000e+00 : f32
    %31 = vector.broadcast %cst_13 : f32 to vector<4x1x128xf32>
    %32 = vector.extract_strided_slice %27 {offsets = [0, 1, 0], sizes = [4, 15, 128], strides = [1, 1, 1]} : vector<4x16x128xf32> to vector<4x15x128xf32>
    %33 = tpu.concatenate %32, %31 in 1 : vector<4x15x128xf32>, vector<4x1x128xf32> -> vector<4x16x128xf32>
    %34 = vector.extract_strided_slice %27 {offsets = [0, 0, 0], sizes = [4, 15, 128], strides = [1, 1, 1]} : vector<4x16x128xf32> to vector<4x15x128xf32>
    %35 = tpu.concatenate %31, %34 in 1 : vector<4x1x128xf32>, vector<4x15x128xf32> -> vector<4x16x128xf32>
    %36 = arith.cmpf one, %33, %35 : vector<4x16x128xf32>
    %cst_14 = arith.constant 0.000000e+00 : f32
    %37 = vector.broadcast %cst_14 : f32 to vector<4x16x1xf32>
    %38 = vector.extract_strided_slice %27 {offsets = [0, 0, 1], sizes = [4, 16, 127], strides = [1, 1, 1]} : vector<4x16x128xf32> to vector<4x16x127xf32>
    %39 = tpu.concatenate %38, %37 in 2 : vector<4x16x127xf32>, vector<4x16x1xf32> -> vector<4x16x128xf32>
    %40 = vector.extract_strided_slice %27 {offsets = [0, 0, 0], sizes = [4, 16, 127], strides = [1, 1, 1]} : vector<4x16x128xf32> to vector<4x16x127xf32>
    %41 = tpu.concatenate %37, %40 in 2 : vector<4x16x1xf32>, vector<4x16x127xf32> -> vector<4x16x128xf32>
    %42 = arith.cmpf one, %39, %41 : vector<4x16x128xf32>
    %43 = arith.ori %30, %36 : vector<4x16x128xi1>
    %44 = arith.ori %43, %42 : vector<4x16x128xi1>
    %c0_15 = arith.constant 0 : index
    %c0_16 = arith.constant 0 : index
    %c0_17 = arith.constant 0 : index
    %45 = vector.load %arg4[%c0_15, %c0_16, %c0_17] : memref<4x16x128xf32, #tpu.memory_space<vmem>>, vector<4x16x128xf32>
    %c0_18 = arith.constant 0 : index
    %c0_19 = arith.constant 0 : index
    %c0_20 = arith.constant 0 : index
    %46 = vector.load %arg5[%c0_18, %c0_19, %c0_20] : memref<1x16x128xf32, #tpu.memory_space<vmem>>, vector<1x16x128xf32>
    %c0_21 = arith.constant 0 : index
    %c0_22 = arith.constant 0 : index
    %c0_23 = arith.constant 0 : index
    %47 = vector.load %arg6[%c0_21, %c0_22, %c0_23] : memref<1x16x128xf32, #tpu.memory_space<vmem>>, vector<1x16x128xf32>
    %cst_24 = arith.constant 0.000000e+00 : f32
    %48 = vector.broadcast %cst_24 : f32 to vector<1x16x128xf32>
    %49 = arith.select %0, %48, %46 : vector<1x16x128xf32>
    %cst_25 = arith.constant 0.000000e+00 : f32
    %50 = vector.broadcast %cst_25 : f32 to vector<1x16x128xf32>
    %51 = arith.select %1, %50, %47 : vector<1x16x128xf32>
    %52 = tpu.concatenate %49, %45, %51 in 0 : vector<1x16x128xf32>, vector<4x16x128xf32>, vector<1x16x128xf32> -> vector<6x16x128xf32>
    %53 = vector.extract_strided_slice %52 {offsets = [1, 0, 0], sizes = [4, 16, 128], strides = [1, 1, 1]} : vector<6x16x128xf32> to vector<4x16x128xf32>
    %54 = vector.extract_strided_slice %52 {offsets = [2, 0, 0], sizes = [4, 16, 128], strides = [1, 1, 1]} : vector<6x16x128xf32> to vector<4x16x128xf32>
    %55 = vector.extract_strided_slice %52 {offsets = [0, 0, 0], sizes = [4, 16, 128], strides = [1, 1, 1]} : vector<6x16x128xf32> to vector<4x16x128xf32>
    %56 = arith.cmpf one, %54, %55 : vector<4x16x128xf32>
    %cst_26 = arith.constant 0.000000e+00 : f32
    %57 = vector.broadcast %cst_26 : f32 to vector<4x1x128xf32>
    %58 = vector.extract_strided_slice %53 {offsets = [0, 1, 0], sizes = [4, 15, 128], strides = [1, 1, 1]} : vector<4x16x128xf32> to vector<4x15x128xf32>
    %59 = tpu.concatenate %58, %57 in 1 : vector<4x15x128xf32>, vector<4x1x128xf32> -> vector<4x16x128xf32>
    %60 = vector.extract_strided_slice %53 {offsets = [0, 0, 0], sizes = [4, 15, 128], strides = [1, 1, 1]} : vector<4x16x128xf32> to vector<4x15x128xf32>
    %61 = tpu.concatenate %57, %60 in 1 : vector<4x1x128xf32>, vector<4x15x128xf32> -> vector<4x16x128xf32>
    %62 = arith.cmpf one, %59, %61 : vector<4x16x128xf32>
    %cst_27 = arith.constant 0.000000e+00 : f32
    %63 = vector.broadcast %cst_27 : f32 to vector<4x16x1xf32>
    %64 = vector.extract_strided_slice %53 {offsets = [0, 0, 1], sizes = [4, 16, 127], strides = [1, 1, 1]} : vector<4x16x128xf32> to vector<4x16x127xf32>
    %65 = tpu.concatenate %64, %63 in 2 : vector<4x16x127xf32>, vector<4x16x1xf32> -> vector<4x16x128xf32>
    %66 = vector.extract_strided_slice %53 {offsets = [0, 0, 0], sizes = [4, 16, 127], strides = [1, 1, 1]} : vector<4x16x128xf32> to vector<4x16x127xf32>
    %67 = tpu.concatenate %63, %66 in 2 : vector<4x16x1xf32>, vector<4x16x127xf32> -> vector<4x16x128xf32>
    %68 = arith.cmpf one, %65, %67 : vector<4x16x128xf32>
    %69 = arith.ori %56, %62 : vector<4x16x128xi1>
    %70 = arith.ori %69, %68 : vector<4x16x128xi1>
    %c0_28 = arith.constant 0 : index
    %71 = memref.load %arg8[%c0_28] : memref<3xf32, #tpu.memory_space<smem>>
    %72 = arith.andi %44, %70 : vector<4x16x128xi1>
    %73 = arith.extui %72 : vector<4x16x128xi1> to vector<4x16x128xi32>
    %74 = arith.sitofp %73 : vector<4x16x128xi32> to vector<4x16x128xf32>
    %75 = vector.shape_cast %74 : vector<4x16x128xf32> to vector<1x4x16x128xf32>
    %cst_29 = arith.constant dense<0.000000e+00> : vector<1xf32>
    %76 = vector.multi_reduction <add>, %75, %cst_29 [1, 2, 3] : vector<1x4x16x128xf32> to vector<1xf32>
    %77 = vector.shape_cast %76 : vector<1xf32> to vector<1x1x1x1xf32>
    %78 = vector.extract %77[0, 0, 0, 0] : f32 from vector<1x1x1x1xf32>
    %79 = arith.addf %71, %78 : f32
    %c0_30 = arith.constant 0 : index
    %80 = memref.load %arg8[%c0_30] : memref<3xf32, #tpu.memory_space<smem>>
    memref.store %79, %arg8[%c0_30] : memref<3xf32, #tpu.memory_space<smem>>
    %c1 = arith.constant 1 : index
    %81 = memref.load %arg8[%c1] : memref<3xf32, #tpu.memory_space<smem>>
    %82 = arith.extui %44 : vector<4x16x128xi1> to vector<4x16x128xi32>
    %83 = arith.sitofp %82 : vector<4x16x128xi32> to vector<4x16x128xf32>
    %84 = vector.shape_cast %83 : vector<4x16x128xf32> to vector<1x4x16x128xf32>
    %cst_31 = arith.constant dense<0.000000e+00> : vector<1xf32>
    %85 = vector.multi_reduction <add>, %84, %cst_31 [1, 2, 3] : vector<1x4x16x128xf32> to vector<1xf32>
    %86 = vector.shape_cast %85 : vector<1xf32> to vector<1x1x1x1xf32>
    %87 = vector.extract %86[0, 0, 0, 0] : f32 from vector<1x1x1x1xf32>
    %88 = arith.addf %81, %87 : f32
    %c1_32 = arith.constant 1 : index
    %89 = memref.load %arg8[%c1_32] : memref<3xf32, #tpu.memory_space<smem>>
    memref.store %88, %arg8[%c1_32] : memref<3xf32, #tpu.memory_space<smem>>
    %c2 = arith.constant 2 : index
    %90 = memref.load %arg8[%c2] : memref<3xf32, #tpu.memory_space<smem>>
    %91 = arith.extui %70 : vector<4x16x128xi1> to vector<4x16x128xi32>
    %92 = arith.sitofp %91 : vector<4x16x128xi32> to vector<4x16x128xf32>
    %93 = vector.shape_cast %92 : vector<4x16x128xf32> to vector<1x4x16x128xf32>
    %cst_33 = arith.constant dense<0.000000e+00> : vector<1xf32>
    %94 = vector.multi_reduction <add>, %93, %cst_33 [1, 2, 3] : vector<1x4x16x128xf32> to vector<1xf32>
    %95 = vector.shape_cast %94 : vector<1xf32> to vector<1x1x1x1xf32>
    %96 = vector.extract %95[0, 0, 0, 0] : f32 from vector<1x1x1x1xf32>
    %97 = arith.addf %90, %96 : f32
    %c2_34 = arith.constant 2 : index
    %98 = memref.load %arg8[%c2_34] : memref<3xf32, #tpu.memory_space<smem>>
    memref.store %97, %arg8[%c2_34] : memref<3xf32, #tpu.memory_space<smem>>
    %99 = arith.extui %1 : i1 to i32
    %c0_i32_35 = arith.constant 0 : i32
    %100 = arith.cmpi ne, %99, %c0_i32_35 : i32
    scf.if %100 {
      %c0_36 = arith.constant 0 : index
      %101 = memref.load %arg8[%c0_36] : memref<3xf32, #tpu.memory_space<smem>>
      %cst_37 = arith.constant 2.000000e+00 : f32
      %102 = arith.mulf %cst_37, %101 : f32
      %cst_38 = arith.constant 1.000000e-07 : f32
      %103 = arith.addf %102, %cst_38 : f32
      %c1_39 = arith.constant 1 : index
      %104 = memref.load %arg8[%c1_39] : memref<3xf32, #tpu.memory_space<smem>>
      %c2_40 = arith.constant 2 : index
      %105 = memref.load %arg8[%c2_40] : memref<3xf32, #tpu.memory_space<smem>>
      %106 = arith.addf %104, %105 : f32
      %cst_41 = arith.constant 1.000000e-07 : f32
      %107 = arith.addf %106, %cst_41 : f32
      %108 = arith.divf %103, %107 : f32
      %cst_42 = arith.constant 1.000000e+00 : f32
      %109 = arith.subf %cst_42, %108 : f32
      %c0_43 = arith.constant 0 : index
      %c0_44 = arith.constant 0 : index
      %110 = memref.load %arg7[%c0_43, %c0_44] : memref<1x1xf32, #tpu.memory_space<smem>>
      memref.store %109, %arg7[%c0_43, %c0_44] : memref<1x1xf32, #tpu.memory_space<smem>>
    } else {
    }
    return
  }
  func.func @transform_0(%arg0: i32) -> (i32, i32, i32) {
    %c0_i32 = arith.constant 0 : i32
    %c0_i32_0 = arith.constant 0 : i32
    %c0_i32_1 = arith.constant 0 : i32
    return %arg0, %c0_i32, %c0_i32_0 : i32, i32, i32
  }
  func.func @transform_1(%arg0: i32) -> (i32, i32, i32) {
    %c4_i32 = arith.constant 4 : i32
    %0 = arith.muli %arg0, %c4_i32 : i32
    %c1_i32 = arith.constant 1 : i32
    %1 = arith.subi %0, %c1_i32 : i32
    %c0_i32 = arith.constant 0 : i32
    %2 = arith.maxsi %1, %c0_i32 : i32
    %c0_i32_0 = arith.constant 0 : i32
    %c0_i32_1 = arith.constant 0 : i32
    %c0_i32_2 = arith.constant 0 : i32
    return %2, %c0_i32_0, %c0_i32_1 : i32, i32, i32
  }
  func.func @transform_2(%arg0: i32) -> (i32, i32, i32) {
    %c4_i32 = arith.constant 4 : i32
    %0 = arith.muli %arg0, %c4_i32 : i32
    %c4_i32_0 = arith.constant 4 : i32
    %1 = arith.addi %0, %c4_i32_0 : i32
    %c15_i32 = arith.constant 15 : i32
    %2 = arith.minsi %1, %c15_i32 : i32
    %c0_i32 = arith.constant 0 : i32
    %c0_i32_1 = arith.constant 0 : i32
    %c0_i32_2 = arith.constant 0 : i32
    return %2, %c0_i32, %c0_i32_1 : i32, i32, i32
  }
  func.func @transform_3(%arg0: i32) -> (i32, i32, i32) {
    %c0_i32 = arith.constant 0 : i32
    %c0_i32_0 = arith.constant 0 : i32
    %c0_i32_1 = arith.constant 0 : i32
    return %arg0, %c0_i32, %c0_i32_0 : i32, i32, i32
  }
  func.func @transform_4(%arg0: i32) -> (i32, i32, i32) {
    %c4_i32 = arith.constant 4 : i32
    %0 = arith.muli %arg0, %c4_i32 : i32
    %c1_i32 = arith.constant 1 : i32
    %1 = arith.subi %0, %c1_i32 : i32
    %c0_i32 = arith.constant 0 : i32
    %2 = arith.maxsi %1, %c0_i32 : i32
    %c0_i32_0 = arith.constant 0 : i32
    %c0_i32_1 = arith.constant 0 : i32
    %c0_i32_2 = arith.constant 0 : i32
    return %2, %c0_i32_0, %c0_i32_1 : i32, i32, i32
  }
  func.func @transform_5(%arg0: i32) -> (i32, i32, i32) {
    %c4_i32 = arith.constant 4 : i32
    %0 = arith.muli %arg0, %c4_i32 : i32
    %c4_i32_0 = arith.constant 4 : i32
    %1 = arith.addi %0, %c4_i32_0 : i32
    %c15_i32 = arith.constant 15 : i32
    %2 = arith.minsi %1, %c15_i32 : i32
    %c0_i32 = arith.constant 0 : i32
    %c0_i32_1 = arith.constant 0 : i32
    %c0_i32_2 = arith.constant 0 : i32
    return %2, %c0_i32, %c0_i32_1 : i32, i32, i32
  }
  func.func @transform_6(%arg0: i32) -> (i32, i32) {
    %c0_i32 = arith.constant 0 : i32
    %c0_i32_0 = arith.constant 0 : i32
    %c0_i32_1 = arith.constant 0 : i32
    return %c0_i32, %c0_i32_0 : i32, i32
  }
}

</mosaic_0001>

<bundles_post_ra>
// kernel: tpu_custom_call.1
= control target key start
LH: loop header
LB: loop body
LE: loop exit
PB: predicated region body
PF: predicated region fallthrough
CT: control target
= control target key end

     0   :  { %s2858_s0 = inlined_call_operand.hbm [shape: f32[16,16,128], index: 0, kind: input, shape index: {}]   ;;  %s2859_s1 = inlined_call_operand.hbm [shape: f32[16,16,128], index: 1, kind: input, shape index: {}]   ;;  %s2860_s2 = inlined_call_operand.hbm [shape: f32[16,16,128], index: 2, kind: input, shape index: {}]   ;;  %s2861_s3 = inlined_call_operand.hbm [shape: f32[16,16,128], index: 3, kind: input, shape index: {}]   ;;  %s2862_s4 = inlined_call_operand.hbm [shape: f32[16,16,128], index: 4, kind: input, shape index: {}]   ;;  %s2863_s5 = inlined_call_operand.hbm [shape: f32[16,16,128], index: 5, kind: input, shape index: {}]   ;;  %s2864_s6 = inlined_call_operand.hbm [shape: f32[1,1], index: 6, kind: output, shape index: {}]  }
   0x1   :  { %2896 = sst [smem:[#allocation31_spill]] %s2859_s1 }
   0x2   :  { %2897 = sst [smem:[#allocation32_spill]] %s2861_s3 }
   0x3   :  { %2898 = sst [smem:[#allocation33_spill]] %s2863_s5 }
   0x4   :  { %2899 = sst [smem:[#allocation34_spill]] %s2864_s6 }
   0x5   :  { %11 = vsyncpa [#allocation4], 0 }
   0x6   :  { %13 = vsyncpa [#allocation4 + $0x1], 0 }
   0x7   :  { %14 = vsyncpa [#allocation7], 0 }
   0x8   :  { %16 = vsyncpa [#allocation7 + $0x1], 0 }
   0x9   :  { %17 = vsyncpa [#allocation10], 0 }
   0xa   :  { %19 = vsyncpa [#allocation10 + $0x1], 0 }
   0xb   :  { %20 = vsyncpa [#allocation13], 0 }
   0xc   :  { %22 = vsyncpa [#allocation13 + $0x1], 0 }
   0xd   :  { %23 = vsyncpa [#allocation5], 0  ;;  %s1907_s21 = smov 0   ;;  %s1909_s22 = smov 0  }
   0xe   :  { %s1911_s23 = smov 0   ;;  %s1913_s24 = smov 0  }
   0xf   :  { %s1915_s25 = smov 0   ;;  %s1917_s26 = smov 0  }
  0x10   :  { %s1919_s27 = smov 0   ;;  %s1921_s28 = smov 0  }
  0x11   :  { %s1923_s29 = smov 0   ;;  %s1925_s30 = smov 0  }
  0x12 LB: > { %2900 = sst [smem:[#allocation22_spill]] %s1837_s25  ;;  %s1956_s7 = sadd.s32 4294967295, %s1857_s30   ;;  %s1857_s30 = sphi %s1925_s30, %s3040_s30   ;;  %s1853_s29 = sphi %s1923_s29, %s3050_s29   ;;  %s1849_s28 = sphi %s1921_s28, %s3049_s28   ;;  %s1845_s27 = sphi %s1919_s27, %s3044_s27   ;;  %s1841_s26 = sphi %s1917_s26, %s3043_s26   ;;  %s1837_s25 = sphi %s1915_s25, %s3042_s25   ;;  %s1833_s24 = sphi %s1913_s24, %s3041_s24   ;;  %s1829_s23 = sphi %s1911_s23, %s3048_s23   ;;  %s1825_s22 = sphi %s1909_s22, %s3047_s22   ;;  %s1821_s21 = sphi %s1907_s21, %s3046_s21  }
  0x13   : > { %2901 = sst [smem:[#allocation23_spill]] %s1841_s26  ;;  %p2872_p0 = scmp.eq.s32.totalorder %s1857_s30, 0 }
  0x14   : > { %2902 = sst [smem:[#allocation24_spill]] %s1849_s28  ;;  %p2871_p1 = scmp.eq.s32.totalorder %s1956_s7, 0 }
  0x15   : > { %s1264_s8 = sshll.u32 %s1857_s30, 2  ;;  %s70_s12 = sadd.s32 1, %s1841_s26 }
  0x16   : > { %s1265_s9 = sadd.s32 4294967295, %s1264_s8  ;;  %s1961_s10 = sadd.s32 4, %s1264_s8 }
  0x17   : > { %p61_p2 = scmp.gt.s32.totalorder %s1265_s9, 0  ;;  %s1267_s11 = sadd.s32 4294967295, %s1961_s10 }
  0x18   : > { %p65_p3 = scmp.gt.s32.totalorder %s1267_s11, 0  ;;  %p77_p4 = scmp.ne.s32.totalorder %s1841_s26, %s1837_s25 }
  0x19   : > { %s3052_s9 = smov (!%p61_p2, %s1265_s9), 0  ;;  %p83_p5 = scmp.ne.s32.totalorder %s1837_s25, %s1833_s24 }
  0x1a   : > { %s3054_s11 = smov (!%p65_p3, %s1267_s11), 0  ;;  %s2867_s14 = sadd.s32 4, %s1961_s10 }
  0x1b   : > { %s67_s13 = ssub.s32 %s3052_s9, %s3054_s11  ;;  %p1971_p7 = por %p77_p4, %p2872_p0 }
  0x1c   : > { %p68_p6 = scmp.eq.s32.totalorder %s67_s13, 0  ;;  %p1977_p8 = por %p83_p5, %p2871_p1 }
  0x1d   : > { %p1983_p9 = scmp.lt.s32.totalorder %s2867_s14, 15  ;;  %p2870_p10 = scmp.lt.s32.totalorder %s1857_s30, 4 }
  0x1e   : > { %s2904_s16 = scalar_select %p1977_p8, 1, 0 }
  0x1f   : > { %s1988_s18 = scalar_select %p68_p6, %s1841_s26, %s70_s12  }
  0x20   : > { %2905 = sst [smem:[#allocation25_spill]] %s2904_s16  ;;  %s280_s20 = sand.u32 1, %s1841_s26  }
  0x21   : > { %2907 = sst [smem:[#allocation26_spill]] %s1988_s18  ;;  %s1282_s24 = sshll.u32 %s280_s20, 4 }
  0x22   : > { %s1367_s8 = sshll.u32 %s3052_s9, 8  ;;  %s2908_s1 = sld [smem:[#allocation31_spill]] }
  0x23   : > { %s282_s16 = scalar_lea.vmem [#allocation6], %s1282_s24  ;;  %p2004_p11 = pnand %p2870_p10, %p1971_p7 }
  0x24   : > { %s293_s14 = sshll.u32 %s282_s16, 4  ;;  %s2011_s11 = scalar_lea.hbm %s2862_s4, %s1367_s8  ;;  %s1998_s14 = int_to_ptr.vmem [resolvable:$true] %s293_s14 }
  0x25   : > { %s2909_s12 = scalar_select %p2004_p11, 1, 0 }
  0x26   : > { %s354_s13 = scalar_lea.vmem [#allocation11], %s1282_s24  ;;  %s2910_s18 = sand.u32 1, %s1857_s30  }
  0x27   : > { %s2013_s19 = sshll.u32 %s354_s13, 4  ;;  %s2017_s16 = scalar_lea.sflag [#allocation7], %s2910_s18  ;;  %s2048_s19 = int_to_ptr.vmem [resolvable:$true] %s2013_s19 }
  0x28   : > { %s1996_s6 = scalar_lea.hbm %s2908_s1, %s1367_s8  ;;  %p2885_p13 = pneg %p2004_p11 }
  0x29   : > { %s1573_s26 = scalar_lea.hbm %s1996_s6, 256  ;;  %s1578_s9 = scalar_lea.hbm %s2908_s1, 4096 }
  0x2a   : > { %p1574_p12 = scmp.ne.s32.totalorder %s1996_s6, %s1573_s26  ;;  %p1579_p4 = scmp.lt.s32.totalorder %s1996_s6, %s2908_s1 }
  0x2b   : > { %p1580_p5 = scmp.lt.s32.totalorder %s1578_s9, %s1573_s26 }
  0x2c   : > { %p1576_p2 = pnand %p2885_p13, %p1574_p12 }
  0x2d   : > { %p1581_p6 = por %p1580_p5, %p1579_p4 }
  0x2e   : > { %p1577_p3 = pneg %p1576_p2 }
  0x30   : > { %p1582_p7 = pnand %p1581_p6, %p1577_p3 }
  0x32   : > { %1585 = shalt.err (!%p1582_p7)
}
  0x33   : > { %s1586_s18 = scalar_lea.vmem %s1998_s14, 256  ;;  %s1859_s24 = smov [#allocation6]  }
  0x34   : > { %p1587_p10 = scmp.ne.s32.totalorder %s1998_s14, %s1586_s18  ;;  %s1591_s13 = sshll.u32 %s1859_s24, 4  ;;  %s1592_s13 = int_to_ptr.vmem [resolvable:$false] %s1591_s13 }
  0x35   : > { %s1593_s15 = scalar_lea.vmem %s1592_s13, 512  ;;  %p1594_p1 = scmp.lt.s32.totalorder %s1998_s14, %s1592_s13 }
  0x36   : > { %p1589_p12 = pnand %p1587_p10, %p2885_p13  ;;  %p1595_p0 = scmp.lt.s32.totalorder %s1593_s15, %s1586_s18 }
  0x38   : > { %p1590_p2 = pneg %p1589_p12  ;;  %p1596_p8 = por %p1595_p0, %p1594_p1 }
  0x3a   : > { %p1597_p4 = pnand %p1596_p8, %p1590_p2 }
  0x3c   : > { %1600 = shalt.err (!%p1597_p4)
}
  0x3d   : > { %s2874_s25 = smov 128   ;;  %s2877_s26 = smov 8  }
  0x3e   : > { %1407 = dma.hbm_to_vmem [thread:$0]  (!%p2004_p11), %s1996_s6, 256, %s1998_s14, %s2017_s16, %s2874_s25, %s2874_s25, %s2877_s26  }
  0x3f   : > { %p1304_p0 = scmp.ge.s32.totalorder %s1857_s30, 1  ;;  %p398_p1 = scmp.lt.s32.totalorder %s1857_s30, 5 }
  0x40   : > { %s2057_s9 = sadd.s32 1, %s1857_s30   ;;  %s36_s8 = sadd.s32 1, %s1853_s29 }
  0x41   : > { %p2052_p8 = pnand %p1304_p0, %p398_p1  ;;  %2913 = sst [smem:[#allocation28_spill]] %s2057_s9 }
  0x42   : > { %s33_s18 = ssub.s32 %s1857_s30, %s2057_s9  ;;  %p43_p10 = scmp.ne.s32.totalorder %s1853_s29, %s1849_s28 }
  0x43   : > { %s2911_s20 = scalar_select %p2052_p8, 1, 0 }
  0x44   : > { %p34_p3 = scmp.eq.s32.totalorder %s33_s18, 0  ;;  %p49_p5 = scmp.ne.s32.totalorder %s1849_s28, %s1845_s27 }
  0x45   : > { %2912 = sst [smem:[#allocation27_spill]] %s2911_s20  ;;  %p2914_p6 = scmp.eq.s32.totalorder %s1857_s30, 0 }
  0x46   : > { %s2876_s6 = sand.u32 1, %s1853_s29   ;;  %p2916_p12 = scmp.eq.s32.totalorder %s1956_s7, 0 }
  0x47   : > { %p45_p7 = por %p2914_p6, %p43_p10  ;;  %s2080_s13 = sshll.u32 %s2876_s6, 6 }
  0x48   : > { %s2070_s14 = scalar_select %p34_p3, %s1853_s29, %s36_s8  }
  0x49   : > { %p2074_p2 = por %p2916_p12, %p49_p5  ;;  %s2881_s15 = sshll.u32 %s1857_s30, 10 }
  0x4a   : > { %2915 = sst [smem:[#allocation29_spill]] %s2070_s14  ;;  %p2919_p4 = scmp.lt.s32.totalorder %s1857_s30, 4 }
  0x4b   : > { %s2917_s24 = scalar_select %p2074_p2, 1, 0 }
  0x4c   : > { %p2085_p0 = pnand %p2919_p4, %p45_p7  ;;  %s2921_s3 = sld [smem:[#allocation32_spill]] }
  0x4d   : > { %2918 = sst [smem:[#allocation30_spill]] %s2917_s24  ;;  %s332_s6 = scalar_lea.vmem [#allocation9], %s2080_s13 }
  0x4e   : > { %s340_s26 = sshll.u32 %s332_s6, 4  ;;  %s2922_s1 = sand.u32 1, %s1857_s30   ;;  %s2097_s26 = int_to_ptr.vmem [resolvable:$true] %s340_s26 }
  0x4f   : > { %s2101_s14 = scalar_lea.sflag [#allocation10], %s2922_s1  ;;  %p1603_p10 = pneg %p2085_p0 }
  0x52   : > { %s2094_s8 = scalar_lea.hbm %s2921_s3, %s2881_s15  ;;  %s1606_s15 = scalar_lea.hbm %s2921_s3, 4096 }
  0x53   : > { %s1601_s9 = scalar_lea.hbm %s2094_s8, 1024  ;;  %p1607_p6 = scmp.lt.s32.totalorder %s2094_s8, %s2921_s3 }
  0x54   : > { %p1602_p1 = scmp.ne.s32.totalorder %s2094_s8, %s1601_s9  ;;  %p1608_p7 = scmp.lt.s32.totalorder %s1606_s15, %s1601_s9 }
  0x56   : > { %p1604_p3 = pnand %p1603_p10, %p1602_p1  ;;  %p1609_p12 = por %p1608_p7, %p1607_p6 }
  0x58   : > { %p1605_p5 = pneg %p1604_p3 }
  0x5a   : > { %p1610_p4 = pnand %p1609_p12, %p1605_p5 }
  0x5c   : > { %1613 = shalt.err (!%p1610_p4)
}
  0x5d   : > { %s1614_s1 = scalar_lea.vmem %s2097_s26, 1024  ;;  %s1862_s6 = smov [#allocation9]  }
  0x5e   : > { %p1615_p13 = scmp.ne.s32.totalorder %s2097_s26, %s1614_s1  ;;  %s1619_s27 = sshll.u32 %s1862_s6, 4  ;;  %s1620_s27 = int_to_ptr.vmem [resolvable:$false] %s1619_s27 }
  0x5f   : > { %s1621_s18 = scalar_lea.vmem %s1620_s27, 2048  ;;  %p1622_p2 = scmp.lt.s32.totalorder %s2097_s26, %s1620_s27 }
  0x60   : > { %p1617_p1 = pnand %p1615_p13, %p1603_p10  ;;  %p1623_p8 = scmp.lt.s32.totalorder %s1621_s18, %s1614_s1 }
  0x62   : > { %p1618_p3 = pneg %p1617_p1  ;;  %p1624_p11 = por %p1623_p8, %p1622_p2 }
  0x64   : > { %p1625_p6 = pnand %p1624_p11, %p1618_p3 }
  0x66   : > { %1628 = shalt.err (!%p1625_p6)
}
  0x67   : > { %s2923_s28 = smov 8   ;;  %s2924_s9 = smov 128  }
  0x68   : > { %1413 = dma.hbm_to_vmem [thread:$0]  (!%p2085_p0), %s2094_s8, 1024, %s2097_s26, %s2101_s14, %s2924_s9, %s2924_s9, %s2923_s28  }
  0x69   : > { %s2925_s24 = sshll.u32 %s1857_s30, 10  ;;  %s260_s27 = scalar_lea.vmem [#allocation3], %s2080_s13 }
  0x6a   : > { %s2136_s1 = scalar_lea.hbm %s2858_s0, %s2925_s24  ;;  %s268_s18 = sshll.u32 %s260_s27, 4  ;;  %s2139_s18 = int_to_ptr.vmem [resolvable:$true] %s268_s18 }
  0x6b   : > { %s2926_s3 = sand.u32 1, %s1853_s29   ;;  %s1629_s5 = scalar_lea.hbm %s2136_s1, 1024 }
  0x6c   : > { %s257_s20 = scalar_lea.sflag [#allocation4], %s2926_s3  ;;  %p1630_p11 = scmp.ne.s32.totalorder %s2136_s1, %s1629_s5 }
  0x6d   : > { %s1634_s24 = scalar_lea.hbm %s2858_s0, 4096  ;;  %p1635_p2 = scmp.lt.s32.totalorder %s2136_s1, %s2858_s0 }
  0x6e   : > { %p1632_p13 = pnand %p1630_p11, %p1603_p10  ;;  %p1636_p5 = scmp.lt.s32.totalorder %s1634_s24, %s1629_s5 }
  0x70   : > { %p1633_p8 = pneg %p1632_p13  ;;  %p1637_p7 = por %p1636_p5, %p1635_p2 }
  0x72   : > { %p1638_p12 = pnand %p1637_p7, %p1633_p8 }
  0x74   : > { %1641 = shalt.err (!%p1638_p12)
}
  0x75   : > { %s1642_s3 = scalar_lea.vmem %s2139_s18, 1024  ;;  %s1863_s13 = smov [#allocation3]  }
  0x76   : > { %p1643_p4 = scmp.ne.s32.totalorder %s2139_s18, %s1642_s3  ;;  %s1647_s27 = sshll.u32 %s1863_s13, 4  ;;  %s1648_s27 = int_to_ptr.vmem [resolvable:$false] %s1647_s27 }
  0x77   : > { %s1649_s26 = scalar_lea.vmem %s1648_s27, 2048  ;;  %p1650_p6 = scmp.lt.s32.totalorder %s2139_s18, %s1648_s27 }
  0x78   : > { %p1645_p1 = pnand %p1643_p4, %p1603_p10  ;;  %p1651_p11 = scmp.lt.s32.totalorder %s1649_s26, %s1642_s3 }
  0x7a   : > { %p1646_p3 = pneg %p1645_p1  ;;  %p1652_p13 = por %p1651_p11, %p1650_p6 }
  0x7c   : > { %p1653_p2 = pnand %p1652_p13, %p1646_p3 }
  0x7e   : > { %1656 = shalt.err (!%p1653_p2)
}
  0x7f   : > { %1404 = dma.hbm_to_vmem [thread:$0]  (!%p2085_p0), %s2136_s1, 1024, %s2139_s18, %s257_s20, %s2924_s9, %s2924_s9, %s2923_s28  }
  0x80   : > { %p95_p10 = scmp.lt.s32.totalorder %s1961_s10, 15  ;;  %s2927_s5 = sadd.s32 4, %s1961_s10 }
  0x81   : > { %s3056_s5 = smov (!%p1983_p9, %s2927_s5), 15  ;;  %s104_s25 = sadd.s32 1, %s1829_s23 }
  0x82   : > { %s3058_s10 = smov (!%p95_p10, %s1961_s10), 15  ;;  %p111_p8 = scmp.ne.s32.totalorder %s1829_s23, %s1825_s22 }
  0x83   : > { %s101_s8 = ssub.s32 %s3058_s10, %s3056_s5  ;;  %p117_p5 = scmp.ne.s32.totalorder %s1825_s22, %s1821_s21 }
  0x84   : > { %p102_p7 = scmp.eq.s32.totalorder %s101_s8, 0  ;;  %p2928_p12 = scmp.eq.s32.totalorder %s1857_s30, 0 }
  0x85   : > { %p2929_p1 = scmp.eq.s32.totalorder %s1956_s7, 0  ;;  %s305_s17 = sand.u32 1, %s1829_s23  }
  0x86   : > { %p113_p4 = por %p111_p8, %p2928_p12  ;;  %s2196_s18 = sshll.u32 %s305_s17, 4 }
  0x87   : > { %p2186_p3 = por %p117_p5, %p2929_p1  ;;  %s1368_s24 = sshll.u32 %s3058_s10, 8 }
  0x88   : > { %s2192_s1 = scalar_select %p102_p7, %s1829_s23, %s104_s25  }
  0x89   : > { %s2930_s20 = scalar_select %p2186_p3, 1, 0 }
  0x8a   : > { %s2204_s21 = scalar_lea.hbm %s2860_s2, %s1368_s24  ;;  %s307_s3 = scalar_lea.vmem [#allocation8], %s2196_s18 }
  0x8b   : > { %s318_s13 = sshll.u32 %s307_s3, 4  ;;  %p2931_p9 = scmp.lt.s32.totalorder %s1857_s30, 4  ;;  %s2213_s13 = int_to_ptr.vmem [resolvable:$true] %s318_s13 }
  0x8c   : > { %s1657_s26 = scalar_lea.hbm %s2204_s21, 256  ;;  %s1662_s30 = scalar_lea.hbm %s2860_s2, 4096 }
  0x8d   : > { %p2209_p0 = pnand %p2931_p9, %p113_p4  ;;  %p1658_p6 = scmp.ne.s32.totalorder %s2204_s21, %s1657_s26 }
  0x8e   : > { %p1663_p10 = scmp.lt.s32.totalorder %s2204_s21, %s2860_s2  ;;  %p1664_p8 = scmp.lt.s32.totalorder %s1662_s30, %s1657_s26 }
  0x8f   : > { %p2891_p11 = pneg %p2209_p0 }
  0x90   : > { %p1665_p5 = por %p1664_p8, %p1663_p10 }
  0x91   : > { %p1660_p13 = pnand %p2891_p11, %p1658_p6 }
  0x93   : > { %p1661_p2 = pneg %p1660_p13 }
  0x95   : > { %p1666_p7 = pnand %p1665_p5, %p1661_p2 }
  0x97   : > { %1669 = shalt.err (!%p1666_p7)
}
  0x98   : > { %s1670_s6 = scalar_lea.vmem %s2213_s13, 256  ;;  %s1864_s3 = smov [#allocation8]  }
  0x99   : > { %p1671_p12 = scmp.ne.s32.totalorder %s2213_s13, %s1670_s6  ;;  %s1675_s5 = sshll.u32 %s1864_s3, 4  ;;  %s1676_s5 = int_to_ptr.vmem [resolvable:$false] %s1675_s5 }
  0x9a   : > { %s1677_s25 = scalar_lea.vmem %s1676_s5, 512  ;;  %p1678_p9 = scmp.lt.s32.totalorder %s2213_s13, %s1676_s5 }
  0x9b   : > { %p1673_p4 = pnand %p1671_p12, %p2891_p11  ;;  %p1679_p6 = scmp.lt.s32.totalorder %s1677_s25, %s1670_s6 }
  0x9d   : > { %p1674_p1 = pneg %p1673_p4  ;;  %p1680_p13 = por %p1679_p6, %p1678_p9 }
  0x9f   : > { %p1681_p10 = pnand %p1680_p13, %p1674_p1 }
  0xa1   : > { %1684 = shalt.err (!%p1681_p10)
}
  0xa2   : > { %1410 = dma.hbm_to_vmem [thread:$0]  (!%p2209_p0), %s2204_s21, 256, %s2213_s13, %s2017_s16, %s2924_s9, %s2924_s9, %s2923_s28  }
  0xa3   : > { %s1685_s26 = scalar_lea.hbm %s2011_s11, 256  ;;  %p2933_p8 = scmp.ne.s32.totalorder %s2909_s12, 0 }
  0xa4   : > { %p1686_p2 = scmp.ne.s32.totalorder %s2011_s11, %s1685_s26  ;;  %s1690_s15 = scalar_lea.hbm %s2862_s4, 4096 }
  0xa5   : > { %p2934_p5 = pneg %p2933_p8  ;;  %p1691_p4 = scmp.lt.s32.totalorder %s2011_s11, %s2862_s4 }
  0xa6   : > { %p1692_p1 = scmp.lt.s32.totalorder %s1690_s15, %s1685_s26 }
  0xa7   : > { %p1688_p7 = pnand %p1686_p2, %p2934_p5 }
  0xa8   : > { %p1693_p9 = por %p1692_p1, %p1691_p4 }
  0xa9   : > { %p1689_p12 = pneg %p1688_p7 }
  0xab   : > { %p1694_p6 = pnand %p1693_p9, %p1689_p12 }
  0xad   : > { %1697 = shalt.err (!%p1694_p6)
}
  0xae   : > { %s1698_s16 = scalar_lea.vmem %s2048_s19, 256  ;;  %p2935_p10 = pmov %p2934_p5 }
  0xaf   : > { %p1699_p13 = scmp.ne.s32.totalorder %s2048_s19, %s1698_s16  ;;  %s1865_s21 = smov [#allocation11]  }
  0xb0   : > { %s1703_s13 = sshll.u32 %s1865_s21, 4  ;;  %s1704_s13 = int_to_ptr.vmem [resolvable:$false] %s1703_s13 }
  0xb1   : > { %p1701_p2 = pnand %p1699_p13, %p2935_p10  ;;  %s1705_s5 = scalar_lea.vmem %s1704_s13, 512 }
  0xb2   : > { %p1706_p7 = scmp.lt.s32.totalorder %s2048_s19, %s1704_s13  ;;  %p1707_p11 = scmp.lt.s32.totalorder %s1705_s5, %s1698_s16 }
  0xb3   : > { %p1702_p5 = pneg %p1701_p2 }
  0xb4   : > { %p1708_p3 = por %p1707_p11, %p1706_p7 }
  0xb6   : > { %p1709_p4 = pnand %p1708_p3, %p1702_p5 }
  0xb8   : > { %1712 = shalt.err (!%p1709_p4)
}
  0xb9   : > { %1416 = dma.hbm_to_vmem [thread:$0]  (!%p2933_p8), %s2011_s11, 256, %s2048_s19, %s2101_s14, %s2924_s9, %s2924_s9, %s2923_s28  }
  0xba   : > { %s2936_s30 = sld [smem:[#allocation33_spill]]  ;;  %s379_s12 = scalar_lea.vmem [#allocation12], %s2196_s18 }
  0xbb   : > { %s390_s6 = sshll.u32 %s379_s12, 4  ;;  %s376_s3 = scalar_lea.sflag [#allocation13], %s305_s17  ;;  %s2277_s6 = int_to_ptr.vmem [resolvable:$true] %s390_s6 }
  0xbc   : > { %p2938_p11 = pneg %p2209_p0 }
  0xc0   : > { %s2937_s8 = smov %s2936_s30  ;;  %s2274_s15 = scalar_lea.hbm %s2936_s30, %s1368_s24 }
  0xc1   : > { %s1713_s16 = scalar_lea.hbm %s2274_s15, 256  ;;  %s1718_s11 = scalar_lea.hbm %s2937_s8, 4096 }
  0xc2   : > { %p1714_p3 = scmp.ne.s32.totalorder %s2274_s15, %s1713_s16  ;;  %p1719_p1 = scmp.lt.s32.totalorder %s2274_s15, %s2937_s8 }
  0xc3   : > { %p1720_p9 = scmp.lt.s32.totalorder %s1718_s11, %s1713_s16 }
  0xc4   : > { %p1716_p8 = pnand %p1714_p3, %p2938_p11 }
  0xc5   : > { %p1721_p6 = por %p1720_p9, %p1719_p1 }
  0xc6   : > { %p1717_p12 = pneg %p1716_p8 }
  0xc8   : > { %p1722_p13 = pnand %p1721_p6, %p1717_p12 }
  0xca   : > { %1725 = shalt.err (!%p1722_p13)
}
  0xcb   : > { %s1726_s17 = scalar_lea.vmem %s2277_s6, 256  ;;  %p2939_p2 = pmov %p2938_p11 }
  0xcc   : > { %p1727_p10 = scmp.ne.s32.totalorder %s2277_s6, %s1726_s17  ;;  %s1866_s18 = smov [#allocation12]  }
  0xcd   : > { %s1731_s21 = sshll.u32 %s1866_s18, 4  ;;  %s1732_s21 = int_to_ptr.vmem [resolvable:$false] %s1731_s21 }
  0xce   : > { %p1729_p5 = pnand %p1727_p10, %p2939_p2  ;;  %s1733_s13 = scalar_lea.vmem %s1732_s21, 512 }
  0xcf   : > { %p1734_p4 = scmp.lt.s32.totalorder %s2277_s6, %s1732_s21  ;;  %p1735_p3 = scmp.lt.s32.totalorder %s1733_s13, %s1726_s17 }
  0xd0   : > { %p1730_p7 = pneg %p1729_p5 }
  0xd1   : > { %p1736_p11 = por %p1735_p3, %p1734_p4 }
  0xd3   : > { %p1737_p8 = pnand %p1736_p11, %p1730_p7 }
  0xd5   : > { %1740 = shalt.err (!%p1737_p8)
}
  0xd6   : > { %1419 = dma.hbm_to_vmem [thread:$0]  (!%p2209_p0), %s2274_s15, 256, %s2277_s6, %s376_s3, %s2924_s9, %s2924_s9, %s2923_s28  }
  0xd7   : > { %s2940_s5 = sld [smem:[#allocation27_spill]] }
  0xdd   : > { %p2941_p12 = scmp.ne.s32.totalorder %s2940_s5, 0 }
  0xde   : > { %s2942_s25 = sld [smem:[#allocation24_spill]] (!%p2941_p12) }
  0xdf   : > { %402 = sbr.rel (%p2941_p12) target bundleno = 747 (0x2eb), region = 44  ;;  %s2943_s26 = sld [smem:[#allocation30_spill]] (!%p2941_p12) }
  0xe4   : > { %s404_s30 = sand.u32 1, %s2942_s25  }
  0xe5   : > { %s1305_s12 = sshll.u32 %s404_s30, 6  ;;  %s405_s16 = scalar_lea.sflag [#allocation4], %s404_s30 }
  0xe6   : > { %s2309_s10 = scalar_lea.vmem [#allocation3], %s1305_s12  ;;  %p2944_p1 = scmp.ne.s32.totalorder %s2943_s26, 0 }
  0xe8   : > { %1792 = dma.done.wait (%p2944_p1), %s405_s16, 1024  }
  0xe9   : > { %1794 = vsyncadd (%p2944_p1), %s405_s16, 4294966272  ;;  %s2945_s27 = sld [smem:[#allocation22_spill]]  ;;  %s413_s11 = sand.u32 1, %s1956_s7  }
  0xea   : > { %s2946_s19 = sld [smem:[#allocation25_spill]]  ;;  %s414_s15 = scalar_lea.sflag [#allocation7], %s413_s11 }
  0xef   : > { %s415_s28 = sand.u32 1, %s2945_s27  }
  0xf0   : > { %s2317_s9 = sshll.u32 %s415_s28, 4  ;;  %p2947_p0 = scmp.ne.s32.totalorder %s2946_s19, 0 }
  0xf1   : > { %s417_s6 = scalar_lea.vmem [#allocation6], %s2317_s9 }
  0xf2   : > { %1796 = dma.done.wait (%p2947_p0), %s414_s15, 256  }
  0xf3   : > { %1798 = vsyncadd (%p2947_p0), %s414_s15, 4294967040  ;;  %s424_s3 = sand.u32 1, %s1825_s22   ;;  %p2948_p9 = scmp.ne.s32.totalorder %s2930_s20, 0 }
  0xf4   : > { %s2325_s14 = sshll.u32 %s424_s3, 4 }
  0xf5   : > { %s426_s24 = scalar_lea.vmem [#allocation8], %s2325_s14 }
  0xf6   : > { %1800 = dma.done.wait (%p2948_p9), %s414_s15, 256  }
  0xf7   : > { %1802 = vsyncadd (%p2948_p9), %s414_s15, 4294967040  ;;  %s432_s17 = scalar_lea.sflag [#allocation10], %s413_s11  ;;  %s2332_s18 = scalar_lea.vmem [#allocation9], %s1305_s12 }
  0xf8   : > { %1804 = dma.done.wait (%p2944_p1), %s432_s17, 1024  }
  0xf9   : > { %1806 = vsyncadd (%p2944_p1), %s432_s17, 4294966272  ;;  %s444_s21 = scalar_lea.vmem [#allocation11], %s2317_s9 }
  0xfa   : > { %1808 = dma.done.wait (%p2947_p0), %s432_s17, 256  }
  0xfb   : > { %1810 = vsyncadd (%p2947_p0), %s432_s17, 4294967040  ;;  %s450_s13 = scalar_lea.sflag [#allocation13], %s424_s3  ;;  %s453_s5 = scalar_lea.vmem [#allocation12], %s2325_s14 }
  0xfc   : > { %1812 = dma.done.wait (%p2948_p9), %s450_s13, 256  }
  0xfd   : > { %1814 = vsyncadd (%p2948_p9), %s450_s13, 4294967040  ;;  %p2949_p6 = scmp.eq.s32.totalorder %s1956_s7, 0  ;;  %vm2893_vm0 = vcmask 1046528   ;;  %v2357_v0 = vld [vmem:[%s2332_s18 + $0x8] sm:$0xff]  ;;  %v789_v1 = vld [vmem:[%s2332_s18] sm:$0xff]  ;;  %vm2894_vm1 = vcmask 1040384  }
  0xfe   : > { %v2361_v2 = vld [vmem:[%s2332_s18 + $0x10] sm:$0xff]  ;;  %s1867_s20 = smov 127   ;;  %v2367_v3 = vld [vmem:[%s2332_s18 + $0x18] sm:$0xff]  ;;  %v2370_v4 = vld [vmem:[%s2332_s18 + $0x20] sm:$0xff]  ;;  %v822_v5 = vrot.slane %v2357_v0, 1  ;;  %v845_v6 = vrot.slane %v789_v1, 7 }
  0xff   : > { %s2350_s25 = scalar_select %p2949_p6, 1, 0  ;;  %879 = vrot.lane.b32.xlu1 %v2357_v0, %s1867_s20  ;;  %877 = vrot.lane.b32.xlu0 %v789_v1, %s1867_s20  ;;  %v846_v7 = vrot.slane %v2357_v0, 7  ;;  %v821_v8 = vrot.slane %v789_v1, 1  ;;  %v531_v9 = vld [vmem:[%s2309_s10] sm:$0xff]  ;;  %v532_v10 = vld [vmem:[%s2309_s10 + $0x8] sm:$0xff]  ;;  %vm807_vm2 = vcmp.ne.f32.partialorder %v2370_v4, %v789_v1 }
 0x100   : > { %p2950_p13 = pmov %p2949_p6  ;;  %v533_v11 = vld [vmem:[%s2309_s10 + $0x10] sm:$0xff]  ;;  %v824_v12 = vrot.slane %v2361_v2, 1  ;;  %v825_v13 = vrot.slane %v2367_v3, 1  ;;  %v848_v14 = vrot.slane %v2361_v2, 7  ;;  %v1312_v15 = vmul.f32 -1.442695, %v531_v9  ;;  %p3036_p2 = pmov %p2949_p6 }
 0x101   : > { %v1313_v16 = vmul.f32 -1.442695, %v532_v10  ;;  %v1314_v17 = vmul.f32 -1.442695, %v533_v11  ;;  %v847_v18 = vsel %vm2894_vm1, %v845_v6, %v846_v7  ;;  %v534_v19 = vld [vmem:[%s2309_s10 + $0x18] sm:$0xff]  ;;  %v535_v20 = vld [vmem:[%s2309_s10 + $0x20] sm:$0xff]  ;;  %v823_v23 = vsel %vm2893_vm0, %v821_v8, %v822_v5 }
 0x102   : > { %s2354_s26 = scalar_select %p2950_p13, 0, 255  ;;  %v536_v21 = vld [vmem:[%s2309_s10 + $0x28] sm:$0xff]  ;;  %v841_v22 = vsel %vm2893_vm0, %v822_v5, 0.0  ;;  %v865_v24 = vsel %vm2894_vm1, 0.0, %v845_v6  ;;  %v826_v25 = vsel %vm2893_vm0, %v824_v12, %v825_v13  ;;  %1523 = vpow2.f32 %v1312_v15  ;;  %v537_v30 = vld [vmem:[%s2309_s10 + $0x30] sm:$0xff] }
 0x103   : > { %s1868_s30 = smov 1   ;;  %v1315_v26 = vmul.f32 -1.442695, %v534_v19  ;;  %v1316_v27 = vmul.f32 -1.442695, %v535_v20  ;;  %1525 = vpow2.f32 %v1313_v16  ;;  %v2393_v29 = vld [vmem:[%s2332_s18 + $0x28] sm:$0xff]  ;;  %vm870_vm3 = vcmp.ne.f32.partialorder %v841_v22, %v847_v18  ;;  %p3037_p5 = pmov %p3036_p2 }
 0x104   : > { %911 = vrot.lane.b32.xlu1 %v2357_v0, %s1868_s30  ;;  %909 = vrot.lane.b32.xlu0 %v789_v1, %s1868_s30  ;;  %v1317_v28 = vmul.f32 -1.442695, %v536_v21  ;;  %vm869_vm4 = vcmp.ne.f32.partialorder %v823_v23, %v865_v24  ;;  %v866_v31 = vsel %vm2894_vm1, 0.0, %v848_v14  ;;  %1527 = vpow2.f32 %v1314_v17  ;;  %v2398_v33 = vld [vmem:[%s2332_s18 + $0x30] sm:$0xff]  ;;  %v538_v34 = vld [vmem:[%s2309_s10 + $0x38] sm:$0xff]  ;;  %p521_p10 = scmp.eq.s32.totalorder %s1956_s7, 3  ;;  %p3038_p7 = pmov %p3036_p2 }
 0x105   : > { %v1318_v32 = vmul.f32 -1.442695, %v537_v30  ;;  %v1513_v35 = vld [vmem:[%s444_s21 + $0x8] sm:%s2354_s26]  ;;  %vm871_vm5 = vcmp.ne.f32.partialorder %v826_v25, %v866_v31  ;;  %vm808_vm6 = vcmp.ne.f32.partialorder %v2393_v29, %v2357_v0  ;;  %1529 = vpow2.f32 %v1315_v26  ;;  %v1516_v37 = vld [vmem:[%s444_s21] sm:%s2354_s26]  ;;  %s1870_s10 = smov 0.0   ;;  %p1350_p4 = scmp.ne.s32.totalorder %s1956_s7, 3 }
 0x106   : > { %v1319_v36 = vmul.f32 -1.442695, %v538_v34  ;;  %vm806_vm7 = vcmp.ne.f32.partialorder %v2367_v3, %v1513_v35  ;;  %vm2412_vm8 = vmor %vm807_vm2, %vm871_vm5  ;;  %v842_v39 = vsel %vm2893_vm0, %v825_v13, 0.0  ;;  %v539_v40 = vld [vmem:[%s417_s6] sm:$0xff]  ;;  %1531 = vpow2.f32 %v1316_v27  ;;  %v540_v43 = vld [vmem:[%s417_s6 + $0x8] sm:$0xff]  ;;  %1394 = sst [smem:[#allocation2]] (%p3036_p2), %s1870_s10 }
 0x107   : > { %vm2424_vm9 = vmor %vm806_vm7, %vm870_vm3  ;;  %vm805_vm10 = vcmp.ne.f32.partialorder %v2361_v2, %v1516_v37  ;;  %v849_v42 = vrot.slane %v2367_v3, 7  ;;  %vm809_vm11 = vcmp.ne.f32.partialorder %v2398_v33, %v2361_v2  ;;  %1533 = vpow2.f32 %v1317_v28  ;;  %v541_v55 = vld [vmem:[%s426_s24] sm:$0xff]  ;;  %v542_v8 = vld [vmem:[%s426_s24 + $0x8] sm:$0xff]  ;;  %s620_s12 = scalar_select %p521_p10, 1, 0 }
 0x108   : > { %913 = vrot.lane.b32.xlu1 %v2361_v2, %s1868_s30  ;;  %881 = vrot.lane.b32.xlu0 %v2361_v2, %s1867_s20  ;;  %vm2435_vm12 = vmor %vm805_vm10, %vm869_vm4  ;;  %v827_v45 = vrot.slane %v2370_v4, 1  ;;  %v828_v46 = vrot.slane %v2393_v29, 1  ;;  %v851_v47 = vrot.slane %v2370_v4, 7  ;;  %1535 = vpow2.f32 %v1318_v32  ;;  %s1518_s16 = scalar_select %p521_p10, 0, 255 }
 0x109   : > { %v850_v48 = vsel %vm2894_vm1, %v848_v14, %v849_v42  ;;  %v1320_v49 = vmul.f32 -1.442695, %v539_v40  ;;  %v1321_v50 = vmul.f32 -1.442695, %v540_v43  ;;  %1537 = vpow2.f32 %v1319_v36  ;;  %1395 = sst [smem:[#allocation2 + $0x1]] (%p3037_p5), %s1870_s10 }
 0x10a   : > { %vm872_vm13 = vcmp.ne.f32.partialorder %v842_v39, %v850_v48  ;;  %v829_v51 = vsel %vm2893_vm0, %v827_v45, %v828_v46  ;;  %v867_v52 = vsel %vm2894_vm1, 0.0, %v851_v47  ;;  %v1322_v56 = vmul.f32 -1.442695, %v541_v55  ;;  %1396 = sst [smem:[#allocation2 + $0x2]] (%p3038_p7), %s1870_s10 }
 0x10b   : > { %vm2456_vm14 = vmor %vm808_vm6, %vm872_vm13  ;;  %vm873_vm15 = vcmp.ne.f32.partialorder %v829_v51, %v867_v52  ;;  %1539 = vpow2.f32 %v1320_v49  ;;  %v1323_v15 = vmul.f32 -1.442695, %v542_v8  ;;  %v616_v20 = vstv %s2350_s25  ;;  %s965_s27 = sld [smem:[#allocation2]] }
 0x10c   : > { %915 = vrot.lane.b32.xlu1 %v2367_v3, %s1868_s30  ;;  %883 = vrot.lane.b32.xlu0 %v2367_v3, %s1867_s20  ;;  %vm2463_vm2 = vmor %vm809_vm11, %vm873_vm15  ;;  %1541 = vpow2.f32 %v1321_v50  ;;  %vm2482_vm3 = vcmp.eq.s32.totalorder %v616_v20, 1  ;;  %s1332_s19 = sld [smem:[#allocation2 + $0x1]] }
 0x10d   : > { %1543 = vpow2.f32 %v1322_v56  ;;  %v2963_v56 = vmov 0  ;;  %s1341_s11 = sld [smem:[#allocation2 + $0x2]] }
 0x10f   : > { %v1524_v57 = vpop.eup %1523 }
 0x110   : > { %917 = vrot.lane.b32.xlu1 %v2370_v4, %s1868_s30  ;;  %885 = vrot.lane.b32.xlu0 %v2370_v4, %s1867_s20  ;;  %v1526_v58 = vpop.eup %1525  ;;  %v567_v59 = vadd.f32 1.0, %v1524_v57 }
 0x111   : > { %v1528_v60 = vpop.eup %1527  ;;  %v568_v61 = vadd.f32 1.0, %v1526_v58 }
 0x112   : > { %v1530_v62 = vpop.eup %1529  ;;  %1545 = vrcp.f32 %v567_v59  ;;  %v569_v63 = vadd.f32 1.0, %v1528_v60 }
 0x113   : > { %v1532_v0 = vpop.eup %1531  ;;  %1547 = vrcp.f32 %v568_v61  ;;  %v570_v1 = vadd.f32 1.0, %v1530_v62 }
 0x114   : > { %v1534_v2 = vpop.eup %1533  ;;  %1549 = vrcp.f32 %v569_v63  ;;  %v571_v5 = vadd.f32 1.0, %v1532_v0 }
 0x115   : > { %v1536_v6 = vpop.eup %1535  ;;  %1551 = vrcp.f32 %v570_v1  ;;  %v572_v7 = vadd.f32 1.0, %v1534_v2  ;;  %v2965_v2 = vmov 0 }
 0x116   : > { %v1538_v9 = vpop.eup %1537  ;;  %1553 = vrcp.f32 %v571_v5  ;;  %v573_v10 = vadd.f32 1.0, %v1536_v6 }
 0x117   : > { %1555 = vrcp.f32 %v572_v7  ;;  %v574_v12 = vadd.f32 1.0, %v1538_v9  ;;  %v2543_v7 = vld [vmem:[%s2332_s18 + $0x38] sm:$0xff] }
 0x118   : > { %v1540_v11 = vpop.eup %1539  ;;  %1557 = vrcp.f32 %v573_v10 }
 0x119   : > { %v1542_v13 = vpop.eup %1541  ;;  %v597_v14 = vadd.f32 1.0, %v1540_v11  ;;  %1559 = vrcp.f32 %v574_v12  ;;  %v852_v11 = vrot.slane %v2393_v29, 7 }
 0x11a   : > { %v598_v16 = vadd.f32 1.0, %v1542_v13  ;;  %v1544_v17 = vpop.eup %1543  ;;  %v2974_v13 = vmov 0 }
 0x11b   : > { %1561 = vrcp.f32 %v597_v14  ;;  %v609_v18 = vadd.f32 1.0, %v1544_v17  ;;  %v621_v14 = vstv %s620_s12 }
 0x11c   : > { %1563 = vrcp.f32 %v598_v16 }
 0x11d   : > { %1565 = vpow2.f32 %v1323_v15 }
 0x11e   : > { %1567 = vrcp.f32 %v609_v18  ;;  %v2977_v18 = vmov 0 }
 0x11f   : > { %v1546_v19 = vpop.eup %1545 }
 0x120   : > { %v1548_v21 = vpop.eup %1547  ;;  %732 = vrot.lane.b32.xlu1 %v1546_v19, %s1868_s30  ;;  %699 = vrot.lane.b32.xlu0 %v1546_v19, %s1867_s20  ;;  %v642_v22 = vrot.slane %v1546_v19, 1  ;;  %v667_v23 = vrot.slane %v1546_v19, 7 }
 0x121   : > { %v2478_v24 = vpop.eup %1549  ;;  %v643_v25 = vrot.slane %v1548_v21, 1  ;;  %v668_v26 = vrot.slane %v1548_v21, 7 }
 0x122   : > { %v2480_v27 = vpop.eup %1551  ;;  %v687_v30 = vsel %vm2894_vm1, 0.0, %v667_v23  ;;  %v645_v31 = vrot.slane %v2478_v24, 1  ;;  %v670_v32 = vrot.slane %v2478_v24, 7 }
 0x123   : > { %v2489_v34 = vpop.eup %1553  ;;  %v644_v35 = vsel %vm2893_vm0, %v642_v22, %v643_v25  ;;  %v662_v36 = vsel %vm2893_vm0, %v643_v25, 0.0  ;;  %v669_v37 = vsel %vm2894_vm1, %v667_v23, %v668_v26  ;;  %v646_v39 = vrot.slane %v2480_v27, 1 }
 0x124   : > { %v2495_v40 = vpop.eup %1555  ;;  %734 = vrot.lane.b32.xlu1 %v1548_v21, %s1868_s30  ;;  %701 = vrot.lane.b32.xlu0 %v1548_v21, %s1867_s20  ;;  %vm691_vm4 = vcmp.ne.f32.partialorder %v644_v35, %v687_v30  ;;  %v688_v42 = vsel %vm2894_vm1, 0.0, %v670_v32  ;;  %vm627_vm6 = vcmp.ne.f32.partialorder %v2489_v34, %v1546_v19  ;;  %v671_v49 = vrot.slane %v2480_v27, 7 }
 0x125   : > { %v2501_v43 = vpop.eup %1557  ;;  %v647_v45 = vsel %vm2893_vm0, %v645_v31, %v646_v39  ;;  %vm628_vm7 = vcmp.ne.f32.partialorder %v2495_v40, %v1548_v21  ;;  %v663_v48 = vsel %vm2893_vm0, %v646_v39, 0.0  ;;  %v648_v51 = vrot.slane %v2489_v34, 1 }
 0x126   : > { %v2507_v50 = vpop.eup %1559  ;;  %vm693_vm10 = vcmp.ne.f32.partialorder %v647_v45, %v688_v42  ;;  %v649_v52 = vrot.slane %v2495_v40, 1  ;;  %v672_v57 = vsel %vm2894_vm1, %v670_v32, %v671_v49  ;;  %v673_v58 = vrot.slane %v2489_v34, 7 }
 0x127   : > { %vm2513_vm13 = vmor %vm627_vm6, %vm693_vm10  ;;  %v674_v59 = vrot.slane %v2495_v40, 7  ;;  %vm694_vm6 = vcmp.ne.f32.partialorder %v663_v48, %v672_v57  ;;  %v651_v15 = vrot.slane %v2501_v43, 1  ;;  %v676_v16 = vrot.slane %v2501_v43, 7 }
 0x128   : > { %v1562_v55 = vpop.eup %1561  ;;  %v2964_v56 = vsel %vm2513_vm13, 4294967295, %v2963_v56  ;;  %736 = vrot.lane.b32.xlu1 %v2478_v24, %s1868_s30  ;;  %703 = vrot.lane.b32.xlu0 %v2478_v24, %s1867_s20  ;;  %v650_v62 = vsel %vm2893_vm0, %v648_v51, %v649_v52  ;;  %v664_v63 = vsel %vm2893_vm0, %v649_v52, 0.0  ;;  %vm2536_vm15 = vmor %vm628_vm7, %vm694_vm6  ;;  %v689_v5 = vsel %vm2894_vm1, 0.0, %v673_v58 }
 0x129   : > { %v1564_v60 = vpop.eup %1563  ;;  %v618_v61 = vsel %vm2482_vm3, 0.0, %v1562_v55  ;;  %v2966_v2 = vsel %vm2536_vm15, 4294967295, %v2965_v2  ;;  %v675_v6 = vsel %vm2894_vm1, %v673_v58, %v674_v59  ;;  %vm2969_vm7 = vcmp.ne.f32.partialorder %v662_v36, %v669_v37  ;;  %v1522_v37 = vld [vmem:[%s453_s5 + $0x8] sm:%s1518_s16] }
 0x12a   : > { %v1566_v0 = vpop.eup %1565  ;;  %vm625_vm10 = vcmp.ne.f32.partialorder %v2478_v24, %v618_v61  ;;  %v619_v1 = vsel %vm2482_vm3, 0.0, %v1564_v60  ;;  %vm695_vm3 = vcmp.ne.f32.partialorder %v650_v62, %v689_v5  ;;  %vm696_vm5 = vcmp.ne.f32.partialorder %v664_v63, %v675_v6 }
 0x12b   : > { %vm2546_vm11 = vmor %vm625_vm10, %vm691_vm4  ;;  %vm626_vm0 = vcmp.ne.f32.partialorder %v2480_v27, %v619_v1  ;;  %vm2972_vm4 = vcmask 1046528   ;;  %v610_v12 = vadd.f32 1.0, %v1566_v0  ;;  %v1568_v17 = vpop.eup %1567  ;;  %v831_v25 = vrot.slane %v2543_v7, 1 }
 0x12c   : > { %vm2554_vm6 = vmor %vm626_vm0, %vm2969_vm7  ;;  %v843_v10 = vsel %vm2972_vm4, %v828_v46, 0.0  ;;  %738 = vrot.lane.b32.xlu1 %v2480_v27, %s1868_s30  ;;  %705 = vrot.lane.b32.xlu0 %v2480_v27, %s1867_s20  ;;  %vm2973_vm0 = vcmp.ne.f32.partialorder %v2501_v43, %v2478_v24  ;;  %v652_v46 = vrot.slane %v2507_v50, 1  ;;  %vm2976_vm7 = vcmp.ne.f32.partialorder %v2507_v50, %v2480_v27  ;;  %v1519_v27 = vld [vmem:[%s453_s5] sm:%s1518_s16] }
 0x12d   : > { %vm2571_vm10 = vmor %vm2973_vm0, %vm695_vm3  ;;  %vm2979_vm3 = vcmask 1040384   ;;  %vm2589_vm0 = vcmp.eq.s32.totalorder %v621_v14, 1  ;;  %1569 = vrcp.f32 %v610_v12  ;;  %v854_v26 = vrot.slane %v2398_v33, 7 }
 0x12e   : > { %v2975_v13 = vsel %vm2571_vm10, 4294967295, %v2974_v13  ;;  %vm2582_vm4 = vmor %vm2976_vm7, %vm696_vm5  ;;  %v853_v19 = vsel %vm2979_vm3, %v851_v47, %v852_v11  ;;  %v623_v21 = vsel %vm2589_vm0, 0.0, %v1568_v17  ;;  %vm2982_vm10 = vcmask 1046528  }
 0x12f   : > { %v2978_v18 = vsel %vm2582_vm4, 4294967295, %v2977_v18  ;;  %vm874_vm1 = vcmp.ne.f32.partialorder %v843_v10, %v853_v19  ;;  %v653_v22 = vsel %vm2982_vm10, %v651_v15, %v652_v46  ;;  %vm2983_vm5 = vmmov %vm2979_vm3  ;;  %vm2984_vm7 = vcmp.ne.f32.partialorder %v2543_v7, %v2367_v3 }
 0x130   : > { %v690_v23 = vsel %vm2983_vm5, 0.0, %v676_v16  ;;  %vm2600_vm4 = vmor %vm2984_vm7, %vm874_vm1  ;;  %vm631_vm3 = vcmp.ne.f32.partialorder %v623_v21, %v2489_v34  ;;  %740 = vrot.lane.b32.xlu1 %v2489_v34, %s1868_s30  ;;  %707 = vrot.lane.b32.xlu0 %v2489_v34, %s1867_s20  ;;  %v2987_v47 = vmov 0  ;;  %v830_v3 = vrot.slane %v2398_v33, 1 }
 0x131   : > { %vm697_vm15 = vcmp.ne.f32.partialorder %v653_v22, %v690_v23  ;;  %vm2989_vm1 = vmmov %vm2982_vm10  ;;  %v2991_v31 = vmov 0  ;;  %v677_v32 = vrot.slane %v2507_v50, 7  ;;  %v2997_v48 = vmov 0 }
 0x132   : > { %vm2609_vm13 = vmor %vm631_vm3, %vm697_vm15  ;;  %v832_v28 = vsel %vm2989_vm1, %v830_v3, %v831_v25  ;;  %vm811_vm15 = vcmp.ne.f32.partialorder %v1519_v27, %v2370_v4  ;;  %v855_v4 = vrot.slane %v2543_v7, 7  ;;  %v3000_v49 = vmov 0 }
 0x133   : > { %v2988_v47 = vsel %vm2609_vm13, 4294967295, %v2987_v47  ;;  %vm2990_vm10 = vmmov %vm2983_vm5  ;;  %v1869_v58 = vmov 0.0  }
 0x134   : > { %v868_v30 = vsel %vm2990_vm10, 0.0, %v854_v26  ;;  %742 = vrot.lane.b32.xlu1 %v2495_v40, %s1868_s30  ;;  %709 = vrot.lane.b32.xlu0 %v2495_v40, %s1867_s20  ;;  %vm2993_vm3 = vmmov %vm2989_vm1 }
 0x135   : > { %vm875_vm5 = vcmp.ne.f32.partialorder %v832_v28, %v868_v30  ;;  %v665_v34 = vsel %vm2993_vm3, %v652_v46, 0.0  ;;  %vm2994_vm1 = vmmov %vm2990_vm10 }
 0x136   : > { %vm2627_vm7 = vmor %vm811_vm15, %vm875_vm5  ;;  %v678_v35 = vsel %vm2994_vm1, %v676_v16, %v677_v32 }
 0x137   : > { %v2992_v31 = vsel %vm2627_vm7, 4294967295, %v2991_v31  ;;  %vm2995_vm15 = vmmov %vm2993_vm3  ;;  %vm812_vm3 = vcmp.ne.f32.partialorder %v1522_v37, %v2393_v29 }
 0x138   : > { %919 = vrot.lane.b32.xlu1 %v2393_v29, %s1868_s30  ;;  %887 = vrot.lane.b32.xlu0 %v2393_v29, %s1867_s20  ;;  %v844_v39 = vsel %vm2995_vm15, %v831_v25, 0.0  ;;  %vm2996_vm5 = vmmov %vm2994_vm1  ;;  %vm2999_vm15 = vcmp.ne.f32.partialorder %v665_v34, %v678_v35 }
 0x139   : > { %v856_v42 = vsel %vm2996_vm5, %v854_v26, %v855_v4 }
 0x13a   : > { %v1570_v36 = vpop.eup %1569  ;;  %vm876_vm1 = vcmp.ne.f32.partialorder %v844_v39, %v856_v42 }
 0x13b   : > { %v624_v45 = vsel %vm2589_vm0, 0.0, %v1570_v36  ;;  %vm2651_vm7 = vmor %vm812_vm3, %vm876_vm1  ;;  %vm2895_vm0 = vcmask 1039360  }
 0x13c   : > { %744 = vrot.lane.b32.xlu1 %v2501_v43, %s1868_s30  ;;  %711 = vrot.lane.b32.xlu0 %v2501_v43, %s1867_s20  ;;  %vm632_vm10 = vcmp.ne.f32.partialorder %v624_v45, %v2495_v40  ;;  %v2998_v48 = vsel %vm2651_vm7, 4294967295, %v2997_v48 }
 0x13d   : > { %vm2656_vm5 = vmor %vm632_vm10, %vm2999_vm15  ;;  %vm756_vm10 = vcmask 7168  }
 0x13e   : > { %v3001_v49 = vsel %vm2656_vm5, 4294967295, %v3000_v49 }
 0x140   : > { %921 = vrot.lane.b32.xlu1 %v2398_v33, %s1868_s30  ;;  %889 = vrot.lane.b32.xlu0 %v2398_v33, %s1867_s20 }
 0x144   : > { %746 = vrot.lane.b32.xlu1 %v2507_v50, %s1868_s30  ;;  %713 = vrot.lane.b32.xlu0 %v2507_v50, %s1867_s20 }
 0x148   : > { %923 = vrot.lane.b32.xlu1 %v2543_v7, %s1868_s30  ;;  %891 = vrot.lane.b32.xlu0 %v2543_v7, %s1867_s20 }
 0x171   : > { %v880_v29 = vpop.permute.xlu1 %879  ;;  %v878_v40 = vpop.permute.xlu0 %877 }
 0x172   : > { %v902_v43 = vsel %vm2895_vm0, %v880_v29, 0.0  ;;  %v901_v33 = vsel %vm2895_vm0, %v878_v40, 0.0 }
 0x176   : > { %v912_v51 = vpop.permute.xlu1 %911  ;;  %v910_v52 = vpop.permute.xlu0 %909 }
 0x177   : > { %v934_v55 = vsel %vm756_vm10, 0.0, %v912_v51  ;;  %v933_v50 = vsel %vm756_vm10, 0.0, %v910_v52 }
 0x178   : > { %vm942_vm3 = vcmp.ne.f32.partialorder %v902_v43, %v934_v55  ;;  %vm941_vm1 = vcmp.ne.f32.partialorder %v901_v33, %v933_v50 }
 0x179   : > { %vm2678_vm15 = vmor %vm2424_vm9, %vm942_vm3  ;;  %vm3006_vm9 = vcmask 1039360  }
 0x17a   : > { %v1343_v59 = vsel %vm2678_vm15, 1.0, %v1869_v58  ;;  %vm2687_vm0 = vmor %vm2435_vm12, %vm941_vm1  ;;  %v914_v61 = vpop.permute.xlu1 %913  ;;  %v882_v62 = vpop.permute.xlu0 %881 }
 0x17b   : > { %v1342_v41 = vsel %vm2687_vm0, 1.0, %v1869_v58  ;;  %v935_v63 = vsel %vm756_vm10, 0.0, %v914_v61  ;;  %v903_v0 = vsel %vm3006_vm9, %v882_v62, 0.0  ;;  %vm3009_vm12 = vmmov %vm3006_vm9 }
 0x17c   : > { %v1062_v1 = vadd.f32 %v1343_v59, %v1342_v41  ;;  %vm943_vm3 = vcmp.ne.f32.partialorder %v903_v0, %v935_v63 }
 0x17d   : > { %vm2698_vm7 = vmor %vm2412_vm8, %vm943_vm3 }
 0x17e   : > { %v1344_v5 = vsel %vm2698_vm7, 1.0, %v1869_v58  ;;  %v916_v6 = vpop.permute.xlu1 %915  ;;  %v884_v7 = vpop.permute.xlu0 %883  ;;  %vm3012_vm8 = vmmov %vm3009_vm12 }
 0x17f   : > { %v1063_v10 = vadd.f32 %v1344_v5, %v1062_v1  ;;  %v936_v11 = vsel %vm756_vm10, 0.0, %v916_v6  ;;  %v904_v12 = vsel %vm3009_vm12, %v884_v7, 0.0 }
 0x180   : > { %vm944_vm1 = vcmp.ne.f32.partialorder %v904_v12, %v936_v11 }
 0x181   : > { %vm2709_vm9 = vmor %vm2456_vm14, %vm944_vm1 }
 0x182   : > { %v1345_v14 = vsel %vm2709_vm9, 1.0, %v1869_v58  ;;  %v918_v15 = vpop.permute.xlu1 %917  ;;  %v886_v46 = vpop.permute.xlu0 %885  ;;  %vm3015_vm14 = vmmov %vm3012_vm8 }
 0x183   : > { %v1064_v16 = vadd.f32 %v1345_v14, %v1063_v10  ;;  %v937_v17 = vsel %vm756_vm10, 0.0, %v918_v15  ;;  %v905_v19 = vsel %vm3012_vm8, %v886_v46, 0.0 }
 0x184   : > { %vm945_vm3 = vcmp.ne.f32.partialorder %v905_v19, %v937_v17 }
 0x185   : > { %vm2720_vm12 = vmor %vm2463_vm2, %vm945_vm3 }
 0x186   : > { %v1346_v20 = vsel %vm2720_vm12, 1.0, %v1869_v58  ;;  %vm3016_vm3 = vmmov %vm3015_vm14 }
 0x187   : > { %v2727_v21 = vadd.f32 %v1346_v20, %v1064_v16 }
 0x192   : > { %v733_v22 = vpop.permute.xlu1 %732  ;;  %v700_v23 = vpop.permute.xlu0 %699 }
 0x193   : > { %v757_v3 = vsel %vm756_vm10, 0.0, %v733_v22  ;;  %v724_v25 = vsel %vm3015_vm14, %v700_v23, 0.0 }
 0x194   : > { %vm765_vm1 = vcmp.ne.f32.partialorder %v724_v25, %v757_v3 }
 0x195   : > { %vm781_vm8 = vmor %vm2546_vm11, %vm765_vm1 }
 0x196   : > { %vm966_vm2 = vmand %vm781_vm8, %vm2687_vm0  ;;  %v735_v54 = vpop.permute.xlu1 %734  ;;  %v702_v26 = vpop.permute.xlu0 %701  ;;  %v1333_v32 = vsel %vm781_vm8, 1.0, %v1869_v58  ;;  %vm3020_vm8 = vnez %v2966_v2 }
 0x197   : > { %v758_v27 = vsel %vm756_vm10, 0.0, %v735_v54  ;;  %v725_v28 = vsel %vm3016_vm3, %v702_v26, 0.0  ;;  %v1324_v30 = vsel %vm966_vm2, 1.0, %v1869_v58  ;;  %vm3017_vm0 = vmmov %vm3016_vm3 }
 0x198   : > { %vm766_vm5 = vcmp.ne.f32.partialorder %v725_v28, %v758_v27 }
 0x199   : > { %vm782_vm13 = vmor %vm2554_vm6, %vm766_vm5  ;;  %vm3018_vm5 = vnez %v2964_v56 }
 0x19a   : > { %vm967_vm11 = vmand %vm782_vm13, %vm2678_vm15  ;;  %v1334_v8 = vsel %vm782_vm13, 1.0, %v1869_v58  ;;  %v737_v34 = vpop.permute.xlu1 %736  ;;  %v704_v35 = vpop.permute.xlu0 %703 }
 0x19b   : > { %v1325_v4 = vsel %vm967_vm11, 1.0, %v1869_v58  ;;  %v1026_v36 = vadd.f32 %v1334_v8, %v1333_v32  ;;  %v759_v37 = vsel %vm756_vm10, 0.0, %v737_v34  ;;  %v726_v39 = vsel %vm3017_vm0, %v704_v35, 0.0  ;;  %vm3019_vm13 = vmmov %vm3017_vm0 }
 0x19c   : > { %v990_v9 = vadd.f32 %v1325_v4, %v1324_v30  ;;  %vm767_vm6 = vcmp.ne.f32.partialorder %v726_v39, %v759_v37 }
 0x19d   : > { %vm783_vm14 = vmor %vm3018_vm5, %vm767_vm6 }
 0x19e   : > { %vm968_vm1 = vmand %vm783_vm14, %vm2698_vm7  ;;  %v1335_v42 = vsel %vm783_vm14, 1.0, %v1869_v58  ;;  %v739_v45 = vpop.permute.xlu1 %738  ;;  %v706_v29 = vpop.permute.xlu0 %705 }
 0x19f   : > { %v1326_v40 = vsel %vm968_vm1, 1.0, %v1869_v58  ;;  %v1027_v43 = vadd.f32 %v1335_v42, %v1026_v36  ;;  %v760_v33 = vsel %vm756_vm10, 0.0, %v739_v45  ;;  %v727_v51 = vsel %vm3019_vm13, %v706_v29, 0.0  ;;  %vm3021_vm7 = vmmov %vm3017_vm0 }
 0x1a0   : > { %v991_v52 = vadd.f32 %v1326_v40, %v990_v9  ;;  %vm768_vm15 = vcmp.ne.f32.partialorder %v727_v51, %v760_v33  ;;  %vm3022_vm0 = vnez %v2975_v13  ;;  %vm3024_vm1 = vnez %v2978_v18 }
 0x1a1   : > { %vm784_vm2 = vmor %vm3020_vm8, %vm768_vm15 }
 0x1a2   : > { %vm969_vm3 = vmand %vm784_vm2, %vm2709_vm9  ;;  %v1336_v56 = vsel %vm784_vm2, 1.0, %v1869_v58  ;;  %v741_v55 = vpop.permute.xlu1 %740  ;;  %v708_v50 = vpop.permute.xlu0 %707 }
 0x1a3   : > { %v1327_v57 = vsel %vm969_vm3, 1.0, %v1869_v58  ;;  %v1028_v59 = vadd.f32 %v1336_v56, %v1027_v43  ;;  %v761_v60 = vsel %vm756_vm10, 0.0, %v741_v55  ;;  %v728_v61 = vsel %vm3021_vm7, %v708_v50, 0.0  ;;  %vm3023_vm9 = vmmov %vm3021_vm7 }
 0x1a4   : > { %v992_v62 = vadd.f32 %v1327_v57, %v991_v52  ;;  %vm769_vm11 = vcmp.ne.f32.partialorder %v728_v61, %v761_v60  ;;  %vm3026_vm3 = vmmov %vm3021_vm7 }
 0x1a5   : > { %vm785_vm6 = vmor %vm3022_vm0, %vm769_vm11  ;;  %vm3027_vm11 = vnez %v2988_v47 }
 0x1a6   : > { %vm970_vm5 = vmand %vm785_vm6, %vm2720_vm12  ;;  %v1337_v2 = vsel %vm785_vm6, 1.0, %v1869_v58  ;;  %v743_v41 = vpop.permute.xlu1 %742  ;;  %v710_v63 = vpop.permute.xlu0 %709 }
 0x1a7   : > { %v1328_v0 = vsel %vm970_vm5, 1.0, %v1869_v58  ;;  %v1029_v1 = vadd.f32 %v1337_v2, %v1028_v59  ;;  %v762_v44 = vsel %vm756_vm10, 0.0, %v743_v41  ;;  %v729_v5 = vsel %vm3023_vm9, %v710_v63, 0.0  ;;  %vm3025_vm12 = vmmov %vm3021_vm7 }
 0x1a8   : > { %v993_v6 = vadd.f32 %v1328_v0, %v992_v62  ;;  %vm770_vm14 = vcmp.ne.f32.partialorder %v729_v5, %v762_v44  ;;  %vm3031_vm5 = vnez %v2992_v31 }
 0x1a9   : > { %vm786_vm13 = vmor %vm3024_vm1, %vm770_vm14 }
 0x1aa   : > { %v1338_v13 = vsel %vm786_vm13, 1.0, %v1869_v58  ;;  %v920_v7 = vpop.permute.xlu1 %919  ;;  %v888_v10 = vpop.permute.xlu0 %887  ;;  %vm3032_vm1 = vmmov %vm3026_vm3 }
 0x1ab   : > { %v1030_v11 = vadd.f32 %v1338_v13, %v1029_v1  ;;  %v938_v12 = vsel %vm756_vm10, 0.0, %v920_v7  ;;  %v906_v38 = vsel %vm3025_vm12, %v888_v10, 0.0  ;;  %vm3033_vm12 = vnez %v3001_v49 }
 0x1ac   : > { %vm946_vm15 = vcmp.ne.f32.partialorder %v906_v38, %v938_v12 }
 0x1ad   : > { %vm962_vm8 = vmor %vm2600_vm4, %vm946_vm15 }
 0x1ae   : > { %vm971_vm2 = vmand %vm786_vm13, %vm962_vm8  ;;  %v1347_v14 = vsel %vm962_vm8, 1.0, %v1869_v58  ;;  %v745_v15 = vpop.permute.xlu1 %744  ;;  %v712_v46 = vpop.permute.xlu0 %711 }
 0x1af   : > { %v1329_v18 = vsel %vm971_vm2, 1.0, %v1869_v58  ;;  %v1066_v16 = vadd.f32 %v1347_v14, %v2727_v21  ;;  %v763_v17 = vsel %vm756_vm10, 0.0, %v745_v15  ;;  %v730_v19 = vsel %vm3026_vm3, %v712_v46, 0.0  ;;  %vm3030_vm4 = vmmov %vm3026_vm3 }
 0x1b0   : > { %vm771_vm7 = vcmp.ne.f32.partialorder %v730_v19, %v763_v17  ;;  %v994_v53 = vadd.f32 %v1329_v18, %v993_v6  ;;  %vm3034_vm8 = vmmov %vm3032_vm1  ;;  %vm3035_vm3 = vnez %v2998_v48 }
 0x1b1   : > { %vm2785_vm0 = vmor %vm3027_vm11, %vm771_vm7 }
 0x1b2   : > { %v1339_v20 = vsel %vm2785_vm0, 1.0, %v1869_v58  ;;  %v922_v22 = vpop.permute.xlu1 %921  ;;  %v890_v23 = vpop.permute.xlu0 %889 }
 0x1b3   : > { %v939_v21 = vsel %vm756_vm10, 0.0, %v922_v22  ;;  %v907_v3 = vsel %vm3030_vm4, %v890_v23, 0.0  ;;  %v1031_v25 = vadd.f32 %v1339_v20, %v1030_v11 }
 0x1b4   : > { %vm947_vm6 = vcmp.ne.f32.partialorder %v907_v3, %v939_v21 }
 0x1b5   : > { %vm963_vm9 = vmor %vm3031_vm5, %vm947_vm6 }
 0x1b6   : > { %vm972_vm14 = vmand %vm2785_vm0, %vm963_vm9  ;;  %v1348_v47 = vsel %vm963_vm9, 1.0, %v1869_v58  ;;  %v747_v54 = vpop.permute.xlu1 %746  ;;  %v714_v26 = vpop.permute.xlu0 %713 }
 0x1b7   : > { %v764_v27 = vsel %vm756_vm10, 0.0, %v747_v54  ;;  %v731_v28 = vsel %vm3032_vm1, %v714_v26, 0.0  ;;  %v1330_v30 = vsel %vm972_vm14, 1.0, %v1869_v58  ;;  %v1067_v32 = vadd.f32 %v1348_v47, %v1066_v16 }
 0x1b8   : > { %vm772_vm13 = vcmp.ne.f32.partialorder %v731_v28, %v764_v27  ;;  %v995_v8 = vadd.f32 %v1330_v30, %v994_v53 }
 0x1b9   : > { %vm788_vm15 = vmor %vm3033_vm12, %vm772_vm13 }
 0x1ba   : > { %v924_v31 = vpop.permute.xlu1 %923  ;;  %v892_v34 = vpop.permute.xlu0 %891  ;;  %v1340_v35 = vsel %vm788_vm15, 1.0, %v1869_v58 }
 0x1bb   : > { %v940_v4 = vsel %vm756_vm10, 0.0, %v924_v31  ;;  %v908_v36 = vsel %vm3034_vm8, %v892_v34, 0.0  ;;  %v1032_v37 = vadd.f32 %v1340_v35, %v1031_v25 }
 0x1bc   : > { %vm948_vm2 = vcmp.ne.f32.partialorder %v908_v36, %v940_v4 }
 0x1bd   : > { %vm964_vm7 = vmor %vm3035_vm3, %vm948_vm2  ;;  %1033 = vadd.xlane.f32.xlu1 %v1032_v37 }
 0x1be   : > { %vm973_vm11 = vmand %vm788_vm15, %vm964_vm7  ;;  %v1349_v49 = vsel %vm964_vm7, 1.0, %v1869_v58 }
 0x1bf   : > { %v1331_v39 = vsel %vm973_vm11, 1.0, %v1869_v58  ;;  %v1068_v9 = vadd.f32 %v1349_v49, %v1067_v32 }
 0x1c0   : > { %v996_v42 = vadd.f32 %v1331_v39, %v995_v8 }
 0x1c2   : > { %997 = vadd.xlane.f32.xlu0 %v996_v42 }
 0x1c6   : > { %1069 = vadd.xlane.f32.xlu0 %v1068_v9 }
 0x246   : > { %v1034_v45 = vpop.xlane.xlu1 %1033 }
 0x247   : > { %v1035_v48 = vrot.slane %v1034_v45, 4 }
 0x249   : > { %v1036_v29 = vadd.f32 %v1035_v48, %v1034_v45 }
 0x24b   : > { %v1037_v40 = vrot.slane %v1036_v29, 2  ;;  %v998_v43 = vpop.xlane.xlu0 %997 }
 0x24c   : > { %v999_v33 = vrot.slane %v998_v43, 4 }
 0x24d   : > { %v1038_v52 = vadd.f32 %v1037_v40, %v1036_v29 }
 0x24e   : > { %v1000_v51 = vadd.f32 %v999_v33, %v998_v43 }
 0x24f   : > { %v1070_v58 = vpop.xlane.xlu0 %1069  ;;  %v1039_v59 = vrot.slane %v1038_v52, 1 }
 0x250   : > { %v1001_v56 = vrot.slane %v1000_v51, 2  ;;  %v1071_v55 = vrot.slane %v1070_v58, 4 }
 0x251   : > { %v1040_v41 = vadd.f32 %v1039_v59, %v1038_v52 }
 0x252   : > { %v1072_v50 = vadd.f32 %v1071_v55, %v1070_v58  ;;  %v1002_v57 = vadd.f32 %v1001_v56, %v1000_v51 }
 0x254   : > { %v1073_v60 = vrot.slane %v1072_v50, 2  ;;  %v1003_v61 = vrot.slane %v1002_v57, 1 }
 0x256   : > { %v1074_v62 = vadd.f32 %v1073_v60, %v1072_v50  ;;  %v1004_v2 = vadd.f32 %v1003_v61, %v1002_v57 }
 0x258   : > { %1373 = vpush %v1004_v2  ;;  %v1075_v63 = vrot.slane %v1074_v62, 1 }
 0x259   : > { %1375 = vpush %v1040_v41 }
 0x25a   : > { %v1076_v0 = vadd.f32 %v1075_v63, %v1074_v62 }
 0x25c   : > { %1377 = vpush %v1076_v0 }
 0x289   : > { %s1374_s28 = spop %1373 }
 0x28a   : > { %s1006_s9 = sadd.f32 %s1374_s28, %s965_s27  ;;  %s1376_s15 = spop %1375 }
 0x28b   : > { %s1042_s6 = sadd.f32 %s1376_s15, %s1332_s19 }
 0x28c   : > { %1008 = sst [smem:[#allocation2]] %s1006_s9  ;;  %1083 = sbr.rel (%p1350_p4) target bundleno = 737 (0x2e1), region = 76 }
 0x28d   : > { %1044 = sst [smem:[#allocation2 + $0x1]] %s1042_s6  ;;  %s1378_s3 = spop %1377 }
 0x28e   : > { %s1078_s14 = sadd.f32 %s1378_s3, %s1341_s11 }
 0x28f   : > { %s1351_s24 = sld [smem:[#allocation2 + $0x1]] (!%p1350_p4) }
 0x290   : > { %1080 = sst [smem:[#allocation2 + $0x2]] %s1078_s14 }
 0x291   : > { %s1352_s17 = sld [smem:[#allocation2 + $0x2]] }
 0x292   : > { %s1084_s13 = sld [smem:[#allocation2]] }
 0x297   : > { %s1089_s18 = sadd.f32 %s1352_s17, %s1351_s24 }
 0x298   : > { %s1085_s5 = smul.f32 2.0, %s1084_s13 }
 0x299   : > { %s1090_s21 = sadd.f32 1e-07, %s1089_s18 }
 0x29a   : > { %s1086_s25 = sadd.f32 1e-07, %s1085_s5 }
 0x29b   : > { %v1091_v1 = vstv %s1090_s21 }
 0x29c   : > { %1571 = vrcp.f32 %v1091_v1 }
 0x2a9   : > { %v1572_v44 = vpop.eup %1571 }
 0x2aa   : > { %1379 = vpush %v1572_v44 }
 0x2db   : > { %s1380_s26 = spop %1379 }
 0x2dc   : > { %s1094_s20 = smul.f32 %s1380_s26, %s1086_s25 }
 0x2de   : > { %s1095_s30 = ssub.f32 1.0, %s1094_s20 }
 0x2e0   : > { %1097 = sst [smem:[#allocation14]] %s1095_s30 }
 0x2e1 PF: > { %s1871_s12 = smov [#allocation14]   ;;  %s3039_s27 = sld [smem:[#allocation34_spill]] }
 0x2e7   : > { %1398 = dma.smem_to_hbm (%p521_p10), %s1871_s12, 16, %s3039_s27, [#allocation5]  }
 0x2e8   : > { %1816 = dma.done.wait (%p521_p10), [#allocation5], 16  }
 0x2e9   : > { %1818 = vsyncadd (%p521_p10), [#allocation5], 4294967280 }
 0x2ea   : > { %1111 = sfence }
 0x2eb PF: > { %s3040_s30 = sld [smem:[#allocation28_spill]]  ;;  %s3046_s21 = smov %s1825_s22 }
 0x2ec   : > { %s3041_s24 = sld [smem:[#allocation22_spill]]  ;;  %s3047_s22 = smov %s1829_s23 }
 0x2ed   : > { %s3042_s25 = sld [smem:[#allocation23_spill]]  ;;  %s3048_s23 = smov %s2192_s1 }
 0x2ee   : > { %s3043_s26 = sld [smem:[#allocation26_spill]]  ;;  %s3049_s28 = smov %s1853_s29 }
 0x2ef   : > { %s3044_s27 = sld [smem:[#allocation24_spill]] }
 0x2f0   : > { %s3045_s19 = sld [smem:[#allocation29_spill]] }
 0x2f1   : > { %p26_p3 = scmp.ge.s32.totalorder %s3040_s30, 6  }
 0x2f3   :  { %28 = sbr.rel (!%p26_p3) target bundleno = 18 (0x12), region = 157 }
 0x2f6   : > { %s3050_s29 = smov %s3045_s19 }
 0x2f8   :  { %1117 = vsyncpa [#allocation4], 1 }
 0x2f9   :  { %1119 = vsyncpa [#allocation4 + $0x1], 1 }
 0x2fa   :  { %1120 = vsyncpa [#allocation7], 1 }
 0x2fb   :  { %1122 = vsyncpa [#allocation7 + $0x1], 1 }
 0x2fc   :  { %1123 = vsyncpa [#allocation10], 1 }
 0x2fd   :  { %1125 = vsyncpa [#allocation10 + $0x1], 1 }
 0x2fe   :  { %1126 = vsyncpa [#allocation13], 1 }
 0x2ff   :  { %1128 = vsyncpa [#allocation13 + $0x1], 1 }
 0x300   :  { %1129 = vsyncpa [#allocation5], 1 }
 0x301   :  { %1131 = vsyncpa [#allocation5 + $0x1], 1 }

</bundles_post_ra>
